<compile_context>
chip_gen: v5e
topology: v5e:2x2
jax: 0.10.0
libtpu: 0.0.40
codegen_flags: <defaults>
</compile_context>

<pallas_src>
import jax
import jax.numpy as jnp
from jax import lax
from jax.experimental import pallas as pl
from jax.experimental.pallas import tpu as pltpu

# ---- config (stand-ins for config['embedding_size'], config['hidden_size'], config['steps']) ----
EMB_MID = 16          # embedding_middle_size
HIDDEN = 32           # hidden_size
STEPS = 8             # steps
NUM_USERS = 16
NUM_SERVICES = 16
TIME_SLOTS = 96       # the `% 96` in the reference forward
INPUT_SIZE = 1
BATCH = 8
FEAT_DIM = NUM_USERS + NUM_SERVICES

# ---- packed parameter-slab row offsets (all multiples of 8: tile-aligned static views) ----
R_W1 = 0                         # (FEAT_DIM, EMB_MID)   rows 0..31
R_B1 = 32                        # (1, EMB_MID)
R_W2 = 40                        # (EMB_MID, HIDDEN)     rows 40..55
R_B2 = 56                        # (1, HIDDEN)
R_WI = 64                        # (1, 3*HIDDEN)  fused input-gate weights
R_WH = 72                        # (HIDDEN, 3*HIDDEN)    rows 72..103
R_BG = 104                       # (1, 3*HIDDEN)  fused gate biases
R_WOUT = 112                     # (1, HIDDEN)    linear_out weight row
R_BOUT = 120                     # (1, 1)         linear_out bias
SLAB_ROWS = 128
SLAB_LANES = 128


# ----------------------------------------------------------------------------
# Fused kernel: gathers + embedding MLP + GRU recurrence + ReLU + linear_out
# ----------------------------------------------------------------------------
def fused_kernel(info_ref, tcol_ref, inv_ref, usim_ref, ssim_ref, slab_ref,
                 out_ref, inv_buf, u_buf, s_buf):
    f32 = jnp.float32
    bf16 = jnp.bfloat16
    B = out_ref.shape[0]
    H = HIDDEN

    # ---- data-dependent gathers: scalar indices (SMEM) drive dynamic sublane
    # slices into VMEM scratch (bit-exact; keeps the MXU free for the recurrence) ----
    for b in range(B):
        u_b = info_ref[b, 1]
        s_b = info_ref[b, 2]
        flat_b = u_b * NUM_SERVICES + s_b
        inv_buf[pl.ds(b, 1), :] = inv_ref[pl.ds(flat_b, 1), :]
        u_buf[pl.ds(b, 1), :] = usim_ref[pl.ds(u_b, 1), :]
        s_buf[pl.ds(b, 1), :] = ssim_ref[pl.ds(s_b, 1), :]

    inv_rows = inv_buf[...]                    # (B, 96)
    u_feat = u_buf[...]                        # (B, NUM_USERS)
    s_feat = s_buf[...]                        # (B, NUM_SERVICES)

    # ---- static views into the packed parameter slab (one prologue DMA) ----
    w1u = slab_ref[R_W1:R_W1 + NUM_USERS, :EMB_MID]
    w1s = slab_ref[R_W1 + NUM_USERS:R_W1 + FEAT_DIM, :EMB_MID]
    b1 = slab_ref[R_B1:R_B1 + 1, :EMB_MID]
    w2 = slab_ref[R_W2:R_W2 + EMB_MID, :HIDDEN]
    b2 = slab_ref[R_B2:R_B2 + 1, :HIDDEN]
    wi = slab_ref[R_WI:R_WI + 1, :3 * H]
    wh = slab_ref[R_WH:R_WH + H, :3 * H]
    bg = slab_ref[R_BG:R_BG + 1, :3 * H]
    wout = slab_ref[R_WOUT:R_WOUT + 1, :HIDDEN]
    bout = slab_ref[R_BOUT:R_BOUT + 1, :1]

    # ---- embedding_model: concat([user_row, service_row]) @ w1 folded into two
    # matmuls on static row-slices of w1.  bf16 operands, f32 accumulation. ----
    hm = jnp.tanh(
        jnp.dot(u_feat.astype(bf16), w1u.astype(bf16), preferred_element_type=f32)
        + jnp.dot(s_feat.astype(bf16), w1s.astype(bf16), preferred_element_type=f32)
        + b1)
    h = jnp.dot(hm.astype(bf16), w2.astype(bf16), preferred_element_type=f32) + b2  # (B, H)

    # ---- input sequence x: 8 masked lane reductions over the gathered rows.
    # Reproduces the PyTorch while-loop exactly: step runs 0..STEPS inclusive and
    # step == STEPS writes row -1 (overwriting step == 0), so sequence row j uses
    # time offset (STEPS-1-j) for j < STEPS-1 and STEPS for j == STEPS-1. ----
    t_col = tcol_ref[...]                      # (B, 1) int32
    lane96 = lax.broadcasted_iota(jnp.int32, (B, TIME_SLOTS), 1)
    x_cols = []
    for t in range(STEPS):
        step_t = STEPS if t == STEPS - 1 else STEPS - 1 - t   # Python int
        tt = t_col - step_t
        tt = jnp.where(tt < 0, tt + TIME_SLOTS, tt)           # exact torch %96
        sel = jnp.where(lane96 == tt, 1.0, 0.0)               # (B, 96)
        x_cols.append(jnp.sum(sel * inv_rows, axis=1, keepdims=True))  # (B, 1)

    # ---- GRU recurrence, fully unrolled; one bf16 MXU matmul per step, short
    # EUP/VPU chain: one tanh-form sigmoid over r|z, h = n + z*(h - n). ----
    wh_b = wh.astype(bf16)                     # loop-invariant RHS, cast once
    for t in range(STEPS):
        hg = jnp.dot(h.astype(bf16), wh_b, preferred_element_type=f32)   # (B, 3H)
        g = x_cols[t] * wi + bg                                          # (B, 3H)
        rz = 0.5 * jnp.tanh(0.5 * (g[:, :2 * H] + hg[:, :2 * H])) + 0.5  # sigmoid(r|z)
        r = rz[:, :H]
        z = rz[:, H:]
        n = jnp.tanh(g[:, 2 * H:] + r * hg[:, 2 * H:])
        h = n + z * (h - n)

    # ---- nn.ReLU + linear_out (lane reduction, not an N=1 matmul) ----
    h = jnp.maximum(h, 0.0)
    out_ref[...] = jnp.sum(h * wout, axis=-1, keepdims=True) + bout


# ----------------------------------------------------------------------------
# Parameter init (deterministic, synthetic); gate fusion + slab packing at init.
# ----------------------------------------------------------------------------
def init_params(key):
    ks = jax.random.split(key, 16)
    s = 0.1

    def nrm(k, shape):
        return (s * jax.random.normal(k, shape)).astype(jnp.float32)

    w1 = nrm(ks[0], (FEAT_DIM, EMB_MID))
    b1 = nrm(ks[1], (1, EMB_MID))
    w2 = nrm(ks[2], (EMB_MID, HIDDEN))
    b2 = nrm(ks[3], (1, HIDDEN))
    wir = nrm(ks[4], (INPUT_SIZE, HIDDEN))
    wiz = nrm(ks[5], (INPUT_SIZE, HIDDEN))
    win = nrm(ks[6], (INPUT_SIZE, HIDDEN))
    whr = nrm(ks[7], (HIDDEN, HIDDEN))
    whz = nrm(ks[8], (HIDDEN, HIDDEN))
    whn = nrm(ks[9], (HIDDEN, HIDDEN))
    br = nrm(ks[10], (1, HIDDEN))
    bz = nrm(ks[11], (1, HIDDEN))
    bn = nrm(ks[12], (1, HIDDEN))
    wout = nrm(ks[13], (HIDDEN, INPUT_SIZE))
    bout = nrm(ks[14], (1, INPUT_SIZE))

    wi_cat = jnp.concatenate([wir, wiz, win], axis=1)   # (1, 3H)
    wh_cat = jnp.concatenate([whr, whz, whn], axis=1)   # (H, 3H)
    b_cat = jnp.concatenate([br, bz, bn], axis=1)       # (1, 3H)

    slab = jnp.zeros((SLAB_ROWS, SLAB_LANES), jnp.float32)
    slab = slab.at[R_W1:R_W1 + FEAT_DIM, :EMB_MID].set(w1)
    slab = slab.at[R_B1:R_B1 + 1, :EMB_MID].set(b1)
    slab = slab.at[R_W2:R_W2 + EMB_MID, :HIDDEN].set(w2)
    slab = slab.at[R_B2:R_B2 + 1, :HIDDEN].set(b2)
    slab = slab.at[R_WI:R_WI + 1, :3 * HIDDEN].set(wi_cat)
    slab = slab.at[R_WH:R_WH + HIDDEN, :3 * HIDDEN].set(wh_cat)
    slab = slab.at[R_BG:R_BG + 1, :3 * HIDDEN].set(b_cat)
    slab = slab.at[R_WOUT:R_WOUT + 1, :HIDDEN].set(wout.T)
    slab = slab.at[R_BOUT:R_BOUT + 1, :INPUT_SIZE].set(bout)
    return {"slab": slab}


# ----------------------------------------------------------------------------
# Forward (mirrors PersonalizeLSTM.forward) — a single pallas_call
# ----------------------------------------------------------------------------
@jax.jit
def personalize_lstm_forward(info_data, invoke_matrix, user_sim, service_sim, params):
    B = info_data.shape[0]
    inv_flat = invoke_matrix.reshape(NUM_USERS * NUM_SERVICES, TIME_SLOTS)
    t_col = info_data[:, 0:1]                  # (B, 1) int32, used vectorized in-kernel

    vmem = pl.BlockSpec(memory_space=pltpu.MemorySpace.VMEM)
    smem = pl.BlockSpec(memory_space=pltpu.MemorySpace.SMEM)

    res = pl.pallas_call(
        fused_kernel,
        out_shape=jax.ShapeDtypeStruct((B, INPUT_SIZE), jnp.float32),
        in_specs=[smem, vmem, vmem, vmem, vmem, vmem],
        out_specs=vmem,
        scratch_shapes=[
            pltpu.VMEM((B, TIME_SLOTS), jnp.float32),
            pltpu.VMEM((B, NUM_USERS), jnp.float32),
            pltpu.VMEM((B, NUM_SERVICES), jnp.float32),
        ],
    )(info_data, t_col, inv_flat, user_sim, service_sim, params["slab"])
    return jnp.squeeze(res, axis=1)            # torch.squeeze(res, 1) -> (B,)


# ----------------------------------------------------------------------------
if __name__ == "__main__":
    key = jax.random.PRNGKey(0)
    k_param, k_inv, k_usim, k_ssim, k_t, k_u, k_s = jax.random.split(key, 7)

    params = init_params(k_param)
    invoke_matrix = jax.random.uniform(
        k_inv, (NUM_USERS, NUM_SERVICES, TIME_SLOTS), jnp.float32
    )
    user_sim = jax.random.uniform(k_usim, (NUM_USERS, NUM_USERS), jnp.float32)
    service_sim = jax.random.uniform(
        k_ssim, (NUM_SERVICES, NUM_SERVICES), jnp.float32
    )

    info_data = jnp.stack(
        [
            jax.random.randint(k_t, (BATCH,), 0, TIME_SLOTS, jnp.int32),
            jax.random.randint(k_u, (BATCH,), 0, NUM_USERS, jnp.int32),
            jax.random.randint(k_s, (BATCH,), 0, NUM_SERVICES, jnp.int32),
        ],
        axis=1,
    )  # (B, 3)

    out = personalize_lstm_forward(
        info_data, invoke_matrix, user_sim, service_sim, params
    )
    out = jax.block_until_ready(out)
    assert out.shape == (BATCH,) and out.dtype == jnp.float32
    assert bool(jnp.all(jnp.isfinite(out)))
    print("KERNEL_OK")
</pallas_src>

<mosaic_0001>
module attributes {stable_mosaic.version = 11 : i64} {
  func.func @fused_kernel(%arg0: memref<8x3xi32, #tpu.memory_space<smem>>, %arg1: memref<8x1xi32, #tpu.memory_space<vmem>>, %arg2: memref<256x96xf32, #tpu.memory_space<vmem>>, %arg3: memref<16x16xf32, #tpu.memory_space<vmem>>, %arg4: memref<16x16xf32, #tpu.memory_space<vmem>>, %arg5: memref<128x128xf32, #tpu.memory_space<vmem>>, %arg6: memref<8x1xf32, #tpu.memory_space<vmem>>, %arg7: memref<8x96xf32, #tpu.memory_space<vmem>>, %arg8: memref<8x16xf32, #tpu.memory_space<vmem>>, %arg9: memref<8x16xf32, #tpu.memory_space<vmem>>) attributes {dimension_semantics = [], scalar_prefetch = 0 : i64, scratch_operands = 3 : i64, tpu.core_type = #tpu.core_type<tc>} {
    %c0 = arith.constant 0 : index
    %c1 = arith.constant 1 : index
    %0 = memref.load %arg0[%c0, %c1] : memref<8x3xi32, #tpu.memory_space<smem>>
    %c0_0 = arith.constant 0 : index
    %c2 = arith.constant 2 : index
    %1 = memref.load %arg0[%c0_0, %c2] : memref<8x3xi32, #tpu.memory_space<smem>>
    %c16_i32 = arith.constant 16 : i32
    %2 = arith.muli %0, %c16_i32 : i32
    %3 = arith.addi %2, %1 : i32
    %4 = arith.index_cast %3 : i32 to index
    %c0_1 = arith.constant 0 : index
    %5 = vector.load %arg2[%4, %c0_1] : memref<256x96xf32, #tpu.memory_space<vmem>>, vector<1x96xf32>
    %c0_2 = arith.constant 0 : index
    %c0_3 = arith.constant 0 : index
    %6 = vector.load %arg7[%c0_2, %c0_3] : memref<8x96xf32, #tpu.memory_space<vmem>>, vector<1x96xf32>
    tpu.vector_store %arg7[%c0_2, %c0_3], %5 {strides = array<i32>} : memref<8x96xf32, #tpu.memory_space<vmem>>, vector<1x96xf32>,
    %7 = arith.index_cast %0 : i32 to index
    %c0_4 = arith.constant 0 : index
    %8 = vector.load %arg3[%7, %c0_4] : memref<16x16xf32, #tpu.memory_space<vmem>>, vector<1x16xf32>
    %c0_5 = arith.constant 0 : index
    %c0_6 = arith.constant 0 : index
    %9 = vector.load %arg8[%c0_5, %c0_6] : memref<8x16xf32, #tpu.memory_space<vmem>>, vector<1x16xf32>
    tpu.vector_store %arg8[%c0_5, %c0_6], %8 {strides = array<i32>} : memref<8x16xf32, #tpu.memory_space<vmem>>, vector<1x16xf32>,
    %10 = arith.index_cast %1 : i32 to index
    %c0_7 = arith.constant 0 : index
    %11 = vector.load %arg4[%10, %c0_7] : memref<16x16xf32, #tpu.memory_space<vmem>>, vector<1x16xf32>
    %c0_8 = arith.constant 0 : index
    %c0_9 = arith.constant 0 : index
    %12 = vector.load %arg9[%c0_8, %c0_9] : memref<8x16xf32, #tpu.memory_space<vmem>>, vector<1x16xf32>
    tpu.vector_store %arg9[%c0_8, %c0_9], %11 {strides = array<i32>} : memref<8x16xf32, #tpu.memory_space<vmem>>, vector<1x16xf32>,
    %c1_10 = arith.constant 1 : index
    %c1_11 = arith.constant 1 : index
    %13 = memref.load %arg0[%c1_10, %c1_11] : memref<8x3xi32, #tpu.memory_space<smem>>
    %c1_12 = arith.constant 1 : index
    %c2_13 = arith.constant 2 : index
    %14 = memref.load %arg0[%c1_12, %c2_13] : memref<8x3xi32, #tpu.memory_space<smem>>
    %c16_i32_14 = arith.constant 16 : i32
    %15 = arith.muli %13, %c16_i32_14 : i32
    %16 = arith.addi %15, %14 : i32
    %17 = arith.index_cast %16 : i32 to index
    %c0_15 = arith.constant 0 : index
    %18 = vector.load %arg2[%17, %c0_15] : memref<256x96xf32, #tpu.memory_space<vmem>>, vector<1x96xf32>
    %c1_16 = arith.constant 1 : index
    %c0_17 = arith.constant 0 : index
    %19 = vector.load %arg7[%c1_16, %c0_17] : memref<8x96xf32, #tpu.memory_space<vmem>>, vector<1x96xf32>
    tpu.vector_store %arg7[%c1_16, %c0_17], %18 {strides = array<i32>} : memref<8x96xf32, #tpu.memory_space<vmem>>, vector<1x96xf32>,
    %20 = arith.index_cast %13 : i32 to index
    %c0_18 = arith.constant 0 : index
    %21 = vector.load %arg3[%20, %c0_18] : memref<16x16xf32, #tpu.memory_space<vmem>>, vector<1x16xf32>
    %c1_19 = arith.constant 1 : index
    %c0_20 = arith.constant 0 : index
    %22 = vector.load %arg8[%c1_19, %c0_20] : memref<8x16xf32, #tpu.memory_space<vmem>>, vector<1x16xf32>
    tpu.vector_store %arg8[%c1_19, %c0_20], %21 {strides = array<i32>} : memref<8x16xf32, #tpu.memory_space<vmem>>, vector<1x16xf32>,
    %23 = arith.index_cast %14 : i32 to index
    %c0_21 = arith.constant 0 : index
    %24 = vector.load %arg4[%23, %c0_21] : memref<16x16xf32, #tpu.memory_space<vmem>>, vector<1x16xf32>
    %c1_22 = arith.constant 1 : index
    %c0_23 = arith.constant 0 : index
    %25 = vector.load %arg9[%c1_22, %c0_23] : memref<8x16xf32, #tpu.memory_space<vmem>>, vector<1x16xf32>
    tpu.vector_store %arg9[%c1_22, %c0_23], %24 {strides = array<i32>} : memref<8x16xf32, #tpu.memory_space<vmem>>, vector<1x16xf32>,
    %c2_24 = arith.constant 2 : index
    %c1_25 = arith.constant 1 : index
    %26 = memref.load %arg0[%c2_24, %c1_25] : memref<8x3xi32, #tpu.memory_space<smem>>
    %c2_26 = arith.constant 2 : index
    %c2_27 = arith.constant 2 : index
    %27 = memref.load %arg0[%c2_26, %c2_27] : memref<8x3xi32, #tpu.memory_space<smem>>
    %c16_i32_28 = arith.constant 16 : i32
    %28 = arith.muli %26, %c16_i32_28 : i32
    %29 = arith.addi %28, %27 : i32
    %30 = arith.index_cast %29 : i32 to index
    %c0_29 = arith.constant 0 : index
    %31 = vector.load %arg2[%30, %c0_29] : memref<256x96xf32, #tpu.memory_space<vmem>>, vector<1x96xf32>
    %c2_30 = arith.constant 2 : index
    %c0_31 = arith.constant 0 : index
    %32 = vector.load %arg7[%c2_30, %c0_31] : memref<8x96xf32, #tpu.memory_space<vmem>>, vector<1x96xf32>
    tpu.vector_store %arg7[%c2_30, %c0_31], %31 {strides = array<i32>} : memref<8x96xf32, #tpu.memory_space<vmem>>, vector<1x96xf32>,
    %33 = arith.index_cast %26 : i32 to index
    %c0_32 = arith.constant 0 : index
    %34 = vector.load %arg3[%33, %c0_32] : memref<16x16xf32, #tpu.memory_space<vmem>>, vector<1x16xf32>
    %c2_33 = arith.constant 2 : index
    %c0_34 = arith.constant 0 : index
    %35 = vector.load %arg8[%c2_33, %c0_34] : memref<8x16xf32, #tpu.memory_space<vmem>>, vector<1x16xf32>
    tpu.vector_store %arg8[%c2_33, %c0_34], %34 {strides = array<i32>} : memref<8x16xf32, #tpu.memory_space<vmem>>, vector<1x16xf32>,
    %36 = arith.index_cast %27 : i32 to index
    %c0_35 = arith.constant 0 : index
    %37 = vector.load %arg4[%36, %c0_35] : memref<16x16xf32, #tpu.memory_space<vmem>>, vector<1x16xf32>
    %c2_36 = arith.constant 2 : index
    %c0_37 = arith.constant 0 : index
    %38 = vector.load %arg9[%c2_36, %c0_37] : memref<8x16xf32, #tpu.memory_space<vmem>>, vector<1x16xf32>
    tpu.vector_store %arg9[%c2_36, %c0_37], %37 {strides = array<i32>} : memref<8x16xf32, #tpu.memory_space<vmem>>, vector<1x16xf32>,
    %c3 = arith.constant 3 : index
    %c1_38 = arith.constant 1 : index
    %39 = memref.load %arg0[%c3, %c1_38] : memref<8x3xi32, #tpu.memory_space<smem>>
    %c3_39 = arith.constant 3 : index
    %c2_40 = arith.constant 2 : index
    %40 = memref.load %arg0[%c3_39, %c2_40] : memref<8x3xi32, #tpu.memory_space<smem>>
    %c16_i32_41 = arith.constant 16 : i32
    %41 = arith.muli %39, %c16_i32_41 : i32
    %42 = arith.addi %41, %40 : i32
    %43 = arith.index_cast %42 : i32 to index
    %c0_42 = arith.constant 0 : index
    %44 = vector.load %arg2[%43, %c0_42] : memref<256x96xf32, #tpu.memory_space<vmem>>, vector<1x96xf32>
    %c3_43 = arith.constant 3 : index
    %c0_44 = arith.constant 0 : index
    %45 = vector.load %arg7[%c3_43, %c0_44] : memref<8x96xf32, #tpu.memory_space<vmem>>, vector<1x96xf32>
    tpu.vector_store %arg7[%c3_43, %c0_44], %44 {strides = array<i32>} : memref<8x96xf32, #tpu.memory_space<vmem>>, vector<1x96xf32>,
    %46 = arith.index_cast %39 : i32 to index
    %c0_45 = arith.constant 0 : index
    %47 = vector.load %arg3[%46, %c0_45] : memref<16x16xf32, #tpu.memory_space<vmem>>, vector<1x16xf32>
    %c3_46 = arith.constant 3 : index
    %c0_47 = arith.constant 0 : index
    %48 = vector.load %arg8[%c3_46, %c0_47] : memref<8x16xf32, #tpu.memory_space<vmem>>, vector<1x16xf32>
    tpu.vector_store %arg8[%c3_46, %c0_47], %47 {strides = array<i32>} : memref<8x16xf32, #tpu.memory_space<vmem>>, vector<1x16xf32>,
    %49 = arith.index_cast %40 : i32 to index
    %c0_48 = arith.constant 0 : index
    %50 = vector.load %arg4[%49, %c0_48] : memref<16x16xf32, #tpu.memory_space<vmem>>, vector<1x16xf32>
    %c3_49 = arith.constant 3 : index
    %c0_50 = arith.constant 0 : index
    %51 = vector.load %arg9[%c3_49, %c0_50] : memref<8x16xf32, #tpu.memory_space<vmem>>, vector<1x16xf32>
    tpu.vector_store %arg9[%c3_49, %c0_50], %50 {strides = array<i32>} : memref<8x16xf32, #tpu.memory_space<vmem>>, vector<1x16xf32>,
    %c4 = arith.constant 4 : index
    %c1_51 = arith.constant 1 : index
    %52 = memref.load %arg0[%c4, %c1_51] : memref<8x3xi32, #tpu.memory_space<smem>>
    %c4_52 = arith.constant 4 : index
    %c2_53 = arith.constant 2 : index
    %53 = memref.load %arg0[%c4_52, %c2_53] : memref<8x3xi32, #tpu.memory_space<smem>>
    %c16_i32_54 = arith.constant 16 : i32
    %54 = arith.muli %52, %c16_i32_54 : i32
    %55 = arith.addi %54, %53 : i32
    %56 = arith.index_cast %55 : i32 to index
    %c0_55 = arith.constant 0 : index
    %57 = vector.load %arg2[%56, %c0_55] : memref<256x96xf32, #tpu.memory_space<vmem>>, vector<1x96xf32>
    %c4_56 = arith.constant 4 : index
    %c0_57 = arith.constant 0 : index
    %58 = vector.load %arg7[%c4_56, %c0_57] : memref<8x96xf32, #tpu.memory_space<vmem>>, vector<1x96xf32>
    tpu.vector_store %arg7[%c4_56, %c0_57], %57 {strides = array<i32>} : memref<8x96xf32, #tpu.memory_space<vmem>>, vector<1x96xf32>,
    %59 = arith.index_cast %52 : i32 to index
    %c0_58 = arith.constant 0 : index
    %60 = vector.load %arg3[%59, %c0_58] : memref<16x16xf32, #tpu.memory_space<vmem>>, vector<1x16xf32>
    %c4_59 = arith.constant 4 : index
    %c0_60 = arith.constant 0 : index
    %61 = vector.load %arg8[%c4_59, %c0_60] : memref<8x16xf32, #tpu.memory_space<vmem>>, vector<1x16xf32>
    tpu.vector_store %arg8[%c4_59, %c0_60], %60 {strides = array<i32>} : memref<8x16xf32, #tpu.memory_space<vmem>>, vector<1x16xf32>,
    %62 = arith.index_cast %53 : i32 to index
    %c0_61 = arith.constant 0 : index
    %63 = vector.load %arg4[%62, %c0_61] : memref<16x16xf32, #tpu.memory_space<vmem>>, vector<1x16xf32>
    %c4_62 = arith.constant 4 : index
    %c0_63 = arith.constant 0 : index
    %64 = vector.load %arg9[%c4_62, %c0_63] : memref<8x16xf32, #tpu.memory_space<vmem>>, vector<1x16xf32>
    tpu.vector_store %arg9[%c4_62, %c0_63], %63 {strides = array<i32>} : memref<8x16xf32, #tpu.memory_space<vmem>>, vector<1x16xf32>,
    %c5 = arith.constant 5 : index
    %c1_64 = arith.constant 1 : index
    %65 = memref.load %arg0[%c5, %c1_64] : memref<8x3xi32, #tpu.memory_space<smem>>
    %c5_65 = arith.constant 5 : index
    %c2_66 = arith.constant 2 : index
    %66 = memref.load %arg0[%c5_65, %c2_66] : memref<8x3xi32, #tpu.memory_space<smem>>
    %c16_i32_67 = arith.constant 16 : i32
    %67 = arith.muli %65, %c16_i32_67 : i32
    %68 = arith.addi %67, %66 : i32
    %69 = arith.index_cast %68 : i32 to index
    %c0_68 = arith.constant 0 : index
    %70 = vector.load %arg2[%69, %c0_68] : memref<256x96xf32, #tpu.memory_space<vmem>>, vector<1x96xf32>
    %c5_69 = arith.constant 5 : index
    %c0_70 = arith.constant 0 : index
    %71 = vector.load %arg7[%c5_69, %c0_70] : memref<8x96xf32, #tpu.memory_space<vmem>>, vector<1x96xf32>
    tpu.vector_store %arg7[%c5_69, %c0_70], %70 {strides = array<i32>} : memref<8x96xf32, #tpu.memory_space<vmem>>, vector<1x96xf32>,
    %72 = arith.index_cast %65 : i32 to index
    %c0_71 = arith.constant 0 : index
    %73 = vector.load %arg3[%72, %c0_71] : memref<16x16xf32, #tpu.memory_space<vmem>>, vector<1x16xf32>
    %c5_72 = arith.constant 5 : index
    %c0_73 = arith.constant 0 : index
    %74 = vector.load %arg8[%c5_72, %c0_73] : memref<8x16xf32, #tpu.memory_space<vmem>>, vector<1x16xf32>
    tpu.vector_store %arg8[%c5_72, %c0_73], %73 {strides = array<i32>} : memref<8x16xf32, #tpu.memory_space<vmem>>, vector<1x16xf32>,
    %75 = arith.index_cast %66 : i32 to index
    %c0_74 = arith.constant 0 : index
    %76 = vector.load %arg4[%75, %c0_74] : memref<16x16xf32, #tpu.memory_space<vmem>>, vector<1x16xf32>
    %c5_75 = arith.constant 5 : index
    %c0_76 = arith.constant 0 : index
    %77 = vector.load %arg9[%c5_75, %c0_76] : memref<8x16xf32, #tpu.memory_space<vmem>>, vector<1x16xf32>
    tpu.vector_store %arg9[%c5_75, %c0_76], %76 {strides = array<i32>} : memref<8x16xf32, #tpu.memory_space<vmem>>, vector<1x16xf32>,
    %c6 = arith.constant 6 : index
    %c1_77 = arith.constant 1 : index
    %78 = memref.load %arg0[%c6, %c1_77] : memref<8x3xi32, #tpu.memory_space<smem>>
    %c6_78 = arith.constant 6 : index
    %c2_79 = arith.constant 2 : index
    %79 = memref.load %arg0[%c6_78, %c2_79] : memref<8x3xi32, #tpu.memory_space<smem>>
    %c16_i32_80 = arith.constant 16 : i32
    %80 = arith.muli %78, %c16_i32_80 : i32
    %81 = arith.addi %80, %79 : i32
    %82 = arith.index_cast %81 : i32 to index
    %c0_81 = arith.constant 0 : index
    %83 = vector.load %arg2[%82, %c0_81] : memref<256x96xf32, #tpu.memory_space<vmem>>, vector<1x96xf32>
    %c6_82 = arith.constant 6 : index
    %c0_83 = arith.constant 0 : index
    %84 = vector.load %arg7[%c6_82, %c0_83] : memref<8x96xf32, #tpu.memory_space<vmem>>, vector<1x96xf32>
    tpu.vector_store %arg7[%c6_82, %c0_83], %83 {strides = array<i32>} : memref<8x96xf32, #tpu.memory_space<vmem>>, vector<1x96xf32>,
    %85 = arith.index_cast %78 : i32 to index
    %c0_84 = arith.constant 0 : index
    %86 = vector.load %arg3[%85, %c0_84] : memref<16x16xf32, #tpu.memory_space<vmem>>, vector<1x16xf32>
    %c6_85 = arith.constant 6 : index
    %c0_86 = arith.constant 0 : index
    %87 = vector.load %arg8[%c6_85, %c0_86] : memref<8x16xf32, #tpu.memory_space<vmem>>, vector<1x16xf32>
    tpu.vector_store %arg8[%c6_85, %c0_86], %86 {strides = array<i32>} : memref<8x16xf32, #tpu.memory_space<vmem>>, vector<1x16xf32>,
    %88 = arith.index_cast %79 : i32 to index
    %c0_87 = arith.constant 0 : index
    %89 = vector.load %arg4[%88, %c0_87] : memref<16x16xf32, #tpu.memory_space<vmem>>, vector<1x16xf32>
    %c6_88 = arith.constant 6 : index
    %c0_89 = arith.constant 0 : index
    %90 = vector.load %arg9[%c6_88, %c0_89] : memref<8x16xf32, #tpu.memory_space<vmem>>, vector<1x16xf32>
    tpu.vector_store %arg9[%c6_88, %c0_89], %89 {strides = array<i32>} : memref<8x16xf32, #tpu.memory_space<vmem>>, vector<1x16xf32>,
    %c7 = arith.constant 7 : index
    %c1_90 = arith.constant 1 : index
    %91 = memref.load %arg0[%c7, %c1_90] : memref<8x3xi32, #tpu.memory_space<smem>>
    %c7_91 = arith.constant 7 : index
    %c2_92 = arith.constant 2 : index
    %92 = memref.load %arg0[%c7_91, %c2_92] : memref<8x3xi32, #tpu.memory_space<smem>>
    %c16_i32_93 = arith.constant 16 : i32
    %93 = arith.muli %91, %c16_i32_93 : i32
    %94 = arith.addi %93, %92 : i32
    %95 = arith.index_cast %94 : i32 to index
    %c0_94 = arith.constant 0 : index
    %96 = vector.load %arg2[%95, %c0_94] : memref<256x96xf32, #tpu.memory_space<vmem>>, vector<1x96xf32>
    %c7_95 = arith.constant 7 : index
    %c0_96 = arith.constant 0 : index
    %97 = vector.load %arg7[%c7_95, %c0_96] : memref<8x96xf32, #tpu.memory_space<vmem>>, vector<1x96xf32>
    tpu.vector_store %arg7[%c7_95, %c0_96], %96 {strides = array<i32>} : memref<8x96xf32, #tpu.memory_space<vmem>>, vector<1x96xf32>,
    %98 = arith.index_cast %91 : i32 to index
    %c0_97 = arith.constant 0 : index
    %99 = vector.load %arg3[%98, %c0_97] : memref<16x16xf32, #tpu.memory_space<vmem>>, vector<1x16xf32>
    %c7_98 = arith.constant 7 : index
    %c0_99 = arith.constant 0 : index
    %100 = vector.load %arg8[%c7_98, %c0_99] : memref<8x16xf32, #tpu.memory_space<vmem>>, vector<1x16xf32>
    tpu.vector_store %arg8[%c7_98, %c0_99], %99 {strides = array<i32>} : memref<8x16xf32, #tpu.memory_space<vmem>>, vector<1x16xf32>,
    %101 = arith.index_cast %92 : i32 to index
    %c0_100 = arith.constant 0 : index
    %102 = vector.load %arg4[%101, %c0_100] : memref<16x16xf32, #tpu.memory_space<vmem>>, vector<1x16xf32>
    %c7_101 = arith.constant 7 : index
    %c0_102 = arith.constant 0 : index
    %103 = vector.load %arg9[%c7_101, %c0_102] : memref<8x16xf32, #tpu.memory_space<vmem>>, vector<1x16xf32>
    tpu.vector_store %arg9[%c7_101, %c0_102], %102 {strides = array<i32>} : memref<8x16xf32, #tpu.memory_space<vmem>>, vector<1x16xf32>,
    %c0_103 = arith.constant 0 : index
    %c0_104 = arith.constant 0 : index
    %104 = vector.load %arg7[%c0_103, %c0_104] : memref<8x96xf32, #tpu.memory_space<vmem>>, vector<8x96xf32>
    %c0_105 = arith.constant 0 : index
    %c0_106 = arith.constant 0 : index
    %105 = vector.load %arg8[%c0_105, %c0_106] : memref<8x16xf32, #tpu.memory_space<vmem>>, vector<8x16xf32>
    %c0_107 = arith.constant 0 : index
    %c0_108 = arith.constant 0 : index
    %106 = vector.load %arg9[%c0_107, %c0_108] : memref<8x16xf32, #tpu.memory_space<vmem>>, vector<8x16xf32>
    %c0_109 = arith.constant 0 : index
    %c0_110 = arith.constant 0 : index
    %107 = vector.load %arg5[%c0_109, %c0_110] : memref<128x128xf32, #tpu.memory_space<vmem>>, vector<16x16xf32>
    %c16 = arith.constant 16 : index
    %c0_111 = arith.constant 0 : index
    %108 = vector.load %arg5[%c16, %c0_111] : memref<128x128xf32, #tpu.memory_space<vmem>>, vector<16x16xf32>
    %c32 = arith.constant 32 : index
    %c0_112 = arith.constant 0 : index
    %109 = vector.load %arg5[%c32, %c0_112] : memref<128x128xf32, #tpu.memory_space<vmem>>, vector<1x16xf32>
    %c40 = arith.constant 40 : index
    %c0_113 = arith.constant 0 : index
    %110 = vector.load %arg5[%c40, %c0_113] : memref<128x128xf32, #tpu.memory_space<vmem>>, vector<16x32xf32>
    %c56 = arith.constant 56 : index
    %c0_114 = arith.constant 0 : index
    %111 = vector.load %arg5[%c56, %c0_114] : memref<128x128xf32, #tpu.memory_space<vmem>>, vector<1x32xf32>
    %c64 = arith.constant 64 : index
    %c0_115 = arith.constant 0 : index
    %112 = vector.load %arg5[%c64, %c0_115] : memref<128x128xf32, #tpu.memory_space<vmem>>, vector<1x96xf32>
    %c72 = arith.constant 72 : index
    %c0_116 = arith.constant 0 : index
    %113 = vector.load %arg5[%c72, %c0_116] : memref<128x128xf32, #tpu.memory_space<vmem>>, vector<32x96xf32>
    %c104 = arith.constant 104 : index
    %c0_117 = arith.constant 0 : index
    %114 = vector.load %arg5[%c104, %c0_117] : memref<128x128xf32, #tpu.memory_space<vmem>>, vector<1x96xf32>
    %c112 = arith.constant 112 : index
    %c0_118 = arith.constant 0 : index
    %115 = vector.load %arg5[%c112, %c0_118] : memref<128x128xf32, #tpu.memory_space<vmem>>, vector<1x32xf32>
    %c120 = arith.constant 120 : index
    %c0_119 = arith.constant 0 : index
    %116 = vector.load %arg5[%c120, %c0_119] : memref<128x128xf32, #tpu.memory_space<vmem>>, vector<1x1xf32>
    %117 = arith.truncf %105 : vector<8x16xf32> to vector<8x16xbf16>
    %118 = arith.truncf %107 : vector<16x16xf32> to vector<16x16xbf16>
    %cst = arith.constant dense<0.000000e+00> : vector<8x16xf32>
    %119 = tpu.matmul %117, %118, %cst {dimension_numbers = #tpu.dot_dimension_numbers<[1], [0], [0], [1], [0, 0, 1, 1], [], []>} : vector<8x16xbf16>, vector<16x16xbf16>, vector<8x16xf32> -> vector<8x16xf32>
    %120 = arith.truncf %106 : vector<8x16xf32> to vector<8x16xbf16>
    %121 = arith.truncf %108 : vector<16x16xf32> to vector<16x16xbf16>
    %cst_120 = arith.constant dense<0.000000e+00> : vector<8x16xf32>
    %122 = tpu.matmul %120, %121, %cst_120 {dimension_numbers = #tpu.dot_dimension_numbers<[1], [0], [0], [1], [0, 0, 1, 1], [], []>} : vector<8x16xbf16>, vector<16x16xbf16>, vector<8x16xf32> -> vector<8x16xf32>
    %123 = arith.addf %119, %122 : vector<8x16xf32>
    %124 = vector.broadcast %109 : vector<1x16xf32> to vector<8x16xf32>
    %125 = arith.addf %123, %124 : vector<8x16xf32>
    %126 = math.tanh %125 : vector<8x16xf32>
    %127 = arith.truncf %126 : vector<8x16xf32> to vector<8x16xbf16>
    %128 = arith.truncf %110 : vector<16x32xf32> to vector<16x32xbf16>
    %cst_121 = arith.constant dense<0.000000e+00> : vector<8x32xf32>
    %129 = tpu.matmul %127, %128, %cst_121 {dimension_numbers = #tpu.dot_dimension_numbers<[1], [0], [0], [1], [0, 0, 1, 1], [], []>} : vector<8x16xbf16>, vector<16x32xbf16>, vector<8x32xf32> -> vector<8x32xf32>
    %130 = vector.broadcast %111 : vector<1x32xf32> to vector<8x32xf32>
    %131 = arith.addf %129, %130 : vector<8x32xf32>
    %c0_122 = arith.constant 0 : index
    %c0_123 = arith.constant 0 : index
    %132 = vector.load %arg1[%c0_122, %c0_123] : memref<8x1xi32, #tpu.memory_space<vmem>>, vector<8x1xi32>
    %133 = tpu.iota {dimensions = array<i32: 1>} : vector<8x96xi32>
    %c7_i32 = arith.constant 7 : i32
    %134 = vector.broadcast %c7_i32 : i32 to vector<8x1xi32>
    %135 = arith.subi %132, %134 : vector<8x1xi32>
    %c0_i32 = arith.constant 0 : i32
    %136 = vector.broadcast %c0_i32 : i32 to vector<8x1xi32>
    %137 = arith.cmpi slt, %135, %136 : vector<8x1xi32>
    %c96_i32 = arith.constant 96 : i32
    %138 = vector.broadcast %c96_i32 : i32 to vector<8x1xi32>
    %139 = arith.addi %135, %138 : vector<8x1xi32>
    %140 = arith.select %137, %139, %135 : vector<8x1xi1>, vector<8x1xi32>
    %141 = vector.broadcast %140 : vector<8x1xi32> to vector<8x96xi32>
    %142 = arith.cmpi eq, %133, %141 : vector<8x96xi32>
    %cst_124 = arith.constant 1.000000e+00 : f32
    %cst_125 = arith.constant 0.000000e+00 : f32
    %143 = vector.broadcast %cst_124 : f32 to vector<8x96xf32>
    %144 = vector.broadcast %cst_125 : f32 to vector<8x96xf32>
    %145 = arith.select %142, %143, %144 : vector<8x96xi1>, vector<8x96xf32>
    %146 = arith.mulf %145, %104 : vector<8x96xf32>
    %cst_126 = arith.constant dense<0.000000e+00> : vector<8xf32>
    %147 = vector.multi_reduction <add>, %146, %cst_126 [1] : vector<8x96xf32> to vector<8xf32>
    %148 = vector.shape_cast %147 : vector<8xf32> to vector<8x1xf32>
    %c6_i32 = arith.constant 6 : i32
    %149 = vector.broadcast %c6_i32 : i32 to vector<8x1xi32>
    %150 = arith.subi %132, %149 : vector<8x1xi32>
    %c0_i32_127 = arith.constant 0 : i32
    %151 = vector.broadcast %c0_i32_127 : i32 to vector<8x1xi32>
    %152 = arith.cmpi slt, %150, %151 : vector<8x1xi32>
    %c96_i32_128 = arith.constant 96 : i32
    %153 = vector.broadcast %c96_i32_128 : i32 to vector<8x1xi32>
    %154 = arith.addi %150, %153 : vector<8x1xi32>
    %155 = arith.select %152, %154, %150 : vector<8x1xi1>, vector<8x1xi32>
    %156 = vector.broadcast %155 : vector<8x1xi32> to vector<8x96xi32>
    %157 = arith.cmpi eq, %133, %156 : vector<8x96xi32>
    %cst_129 = arith.constant 1.000000e+00 : f32
    %cst_130 = arith.constant 0.000000e+00 : f32
    %158 = vector.broadcast %cst_129 : f32 to vector<8x96xf32>
    %159 = vector.broadcast %cst_130 : f32 to vector<8x96xf32>
    %160 = arith.select %157, %158, %159 : vector<8x96xi1>, vector<8x96xf32>
    %161 = arith.mulf %160, %104 : vector<8x96xf32>
    %cst_131 = arith.constant dense<0.000000e+00> : vector<8xf32>
    %162 = vector.multi_reduction <add>, %161, %cst_131 [1] : vector<8x96xf32> to vector<8xf32>
    %163 = vector.shape_cast %162 : vector<8xf32> to vector<8x1xf32>
    %c5_i32 = arith.constant 5 : i32
    %164 = vector.broadcast %c5_i32 : i32 to vector<8x1xi32>
    %165 = arith.subi %132, %164 : vector<8x1xi32>
    %c0_i32_132 = arith.constant 0 : i32
    %166 = vector.broadcast %c0_i32_132 : i32 to vector<8x1xi32>
    %167 = arith.cmpi slt, %165, %166 : vector<8x1xi32>
    %c96_i32_133 = arith.constant 96 : i32
    %168 = vector.broadcast %c96_i32_133 : i32 to vector<8x1xi32>
    %169 = arith.addi %165, %168 : vector<8x1xi32>
    %170 = arith.select %167, %169, %165 : vector<8x1xi1>, vector<8x1xi32>
    %171 = vector.broadcast %170 : vector<8x1xi32> to vector<8x96xi32>
    %172 = arith.cmpi eq, %133, %171 : vector<8x96xi32>
    %cst_134 = arith.constant 1.000000e+00 : f32
    %cst_135 = arith.constant 0.000000e+00 : f32
    %173 = vector.broadcast %cst_134 : f32 to vector<8x96xf32>
    %174 = vector.broadcast %cst_135 : f32 to vector<8x96xf32>
    %175 = arith.select %172, %173, %174 : vector<8x96xi1>, vector<8x96xf32>
    %176 = arith.mulf %175, %104 : vector<8x96xf32>
    %cst_136 = arith.constant dense<0.000000e+00> : vector<8xf32>
    %177 = vector.multi_reduction <add>, %176, %cst_136 [1] : vector<8x96xf32> to vector<8xf32>
    %178 = vector.shape_cast %177 : vector<8xf32> to vector<8x1xf32>
    %c4_i32 = arith.constant 4 : i32
    %179 = vector.broadcast %c4_i32 : i32 to vector<8x1xi32>
    %180 = arith.subi %132, %179 : vector<8x1xi32>
    %c0_i32_137 = arith.constant 0 : i32
    %181 = vector.broadcast %c0_i32_137 : i32 to vector<8x1xi32>
    %182 = arith.cmpi slt, %180, %181 : vector<8x1xi32>
    %c96_i32_138 = arith.constant 96 : i32
    %183 = vector.broadcast %c96_i32_138 : i32 to vector<8x1xi32>
    %184 = arith.addi %180, %183 : vector<8x1xi32>
    %185 = arith.select %182, %184, %180 : vector<8x1xi1>, vector<8x1xi32>
    %186 = vector.broadcast %185 : vector<8x1xi32> to vector<8x96xi32>
    %187 = arith.cmpi eq, %133, %186 : vector<8x96xi32>
    %cst_139 = arith.constant 1.000000e+00 : f32
    %cst_140 = arith.constant 0.000000e+00 : f32
    %188 = vector.broadcast %cst_139 : f32 to vector<8x96xf32>
    %189 = vector.broadcast %cst_140 : f32 to vector<8x96xf32>
    %190 = arith.select %187, %188, %189 : vector<8x96xi1>, vector<8x96xf32>
    %191 = arith.mulf %190, %104 : vector<8x96xf32>
    %cst_141 = arith.constant dense<0.000000e+00> : vector<8xf32>
    %192 = vector.multi_reduction <add>, %191, %cst_141 [1] : vector<8x96xf32> to vector<8xf32>
    %193 = vector.shape_cast %192 : vector<8xf32> to vector<8x1xf32>
    %c3_i32 = arith.constant 3 : i32
    %194 = vector.broadcast %c3_i32 : i32 to vector<8x1xi32>
    %195 = arith.subi %132, %194 : vector<8x1xi32>
    %c0_i32_142 = arith.constant 0 : i32
    %196 = vector.broadcast %c0_i32_142 : i32 to vector<8x1xi32>
    %197 = arith.cmpi slt, %195, %196 : vector<8x1xi32>
    %c96_i32_143 = arith.constant 96 : i32
    %198 = vector.broadcast %c96_i32_143 : i32 to vector<8x1xi32>
    %199 = arith.addi %195, %198 : vector<8x1xi32>
    %200 = arith.select %197, %199, %195 : vector<8x1xi1>, vector<8x1xi32>
    %201 = vector.broadcast %200 : vector<8x1xi32> to vector<8x96xi32>
    %202 = arith.cmpi eq, %133, %201 : vector<8x96xi32>
    %cst_144 = arith.constant 1.000000e+00 : f32
    %cst_145 = arith.constant 0.000000e+00 : f32
    %203 = vector.broadcast %cst_144 : f32 to vector<8x96xf32>
    %204 = vector.broadcast %cst_145 : f32 to vector<8x96xf32>
    %205 = arith.select %202, %203, %204 : vector<8x96xi1>, vector<8x96xf32>
    %206 = arith.mulf %205, %104 : vector<8x96xf32>
    %cst_146 = arith.constant dense<0.000000e+00> : vector<8xf32>
    %207 = vector.multi_reduction <add>, %206, %cst_146 [1] : vector<8x96xf32> to vector<8xf32>
    %208 = vector.shape_cast %207 : vector<8xf32> to vector<8x1xf32>
    %c2_i32 = arith.constant 2 : i32
    %209 = vector.broadcast %c2_i32 : i32 to vector<8x1xi32>
    %210 = arith.subi %132, %209 : vector<8x1xi32>
    %c0_i32_147 = arith.constant 0 : i32
    %211 = vector.broadcast %c0_i32_147 : i32 to vector<8x1xi32>
    %212 = arith.cmpi slt, %210, %211 : vector<8x1xi32>
    %c96_i32_148 = arith.constant 96 : i32
    %213 = vector.broadcast %c96_i32_148 : i32 to vector<8x1xi32>
    %214 = arith.addi %210, %213 : vector<8x1xi32>
    %215 = arith.select %212, %214, %210 : vector<8x1xi1>, vector<8x1xi32>
    %216 = vector.broadcast %215 : vector<8x1xi32> to vector<8x96xi32>
    %217 = arith.cmpi eq, %133, %216 : vector<8x96xi32>
    %cst_149 = arith.constant 1.000000e+00 : f32
    %cst_150 = arith.constant 0.000000e+00 : f32
    %218 = vector.broadcast %cst_149 : f32 to vector<8x96xf32>
    %219 = vector.broadcast %cst_150 : f32 to vector<8x96xf32>
    %220 = arith.select %217, %218, %219 : vector<8x96xi1>, vector<8x96xf32>
    %221 = arith.mulf %220, %104 : vector<8x96xf32>
    %cst_151 = arith.constant dense<0.000000e+00> : vector<8xf32>
    %222 = vector.multi_reduction <add>, %221, %cst_151 [1] : vector<8x96xf32> to vector<8xf32>
    %223 = vector.shape_cast %222 : vector<8xf32> to vector<8x1xf32>
    %c1_i32 = arith.constant 1 : i32
    %224 = vector.broadcast %c1_i32 : i32 to vector<8x1xi32>
    %225 = arith.subi %132, %224 : vector<8x1xi32>
    %c0_i32_152 = arith.constant 0 : i32
    %226 = vector.broadcast %c0_i32_152 : i32 to vector<8x1xi32>
    %227 = arith.cmpi slt, %225, %226 : vector<8x1xi32>
    %c96_i32_153 = arith.constant 96 : i32
    %228 = vector.broadcast %c96_i32_153 : i32 to vector<8x1xi32>
    %229 = arith.addi %225, %228 : vector<8x1xi32>
    %230 = arith.select %227, %229, %225 : vector<8x1xi1>, vector<8x1xi32>
    %231 = vector.broadcast %230 : vector<8x1xi32> to vector<8x96xi32>
    %232 = arith.cmpi eq, %133, %231 : vector<8x96xi32>
    %cst_154 = arith.constant 1.000000e+00 : f32
    %cst_155 = arith.constant 0.000000e+00 : f32
    %233 = vector.broadcast %cst_154 : f32 to vector<8x96xf32>
    %234 = vector.broadcast %cst_155 : f32 to vector<8x96xf32>
    %235 = arith.select %232, %233, %234 : vector<8x96xi1>, vector<8x96xf32>
    %236 = arith.mulf %235, %104 : vector<8x96xf32>
    %cst_156 = arith.constant dense<0.000000e+00> : vector<8xf32>
    %237 = vector.multi_reduction <add>, %236, %cst_156 [1] : vector<8x96xf32> to vector<8xf32>
    %238 = vector.shape_cast %237 : vector<8xf32> to vector<8x1xf32>
    %c8_i32 = arith.constant 8 : i32
    %239 = vector.broadcast %c8_i32 : i32 to vector<8x1xi32>
    %240 = arith.subi %132, %239 : vector<8x1xi32>
    %c0_i32_157 = arith.constant 0 : i32
    %241 = vector.broadcast %c0_i32_157 : i32 to vector<8x1xi32>
    %242 = arith.cmpi slt, %240, %241 : vector<8x1xi32>
    %c96_i32_158 = arith.constant 96 : i32
    %243 = vector.broadcast %c96_i32_158 : i32 to vector<8x1xi32>
    %244 = arith.addi %240, %243 : vector<8x1xi32>
    %245 = arith.select %242, %244, %240 : vector<8x1xi1>, vector<8x1xi32>
    %246 = vector.broadcast %245 : vector<8x1xi32> to vector<8x96xi32>
    %247 = arith.cmpi eq, %133, %246 : vector<8x96xi32>
    %cst_159 = arith.constant 1.000000e+00 : f32
    %cst_160 = arith.constant 0.000000e+00 : f32
    %248 = vector.broadcast %cst_159 : f32 to vector<8x96xf32>
    %249 = vector.broadcast %cst_160 : f32 to vector<8x96xf32>
    %250 = arith.select %247, %248, %249 : vector<8x96xi1>, vector<8x96xf32>
    %251 = arith.mulf %250, %104 : vector<8x96xf32>
    %cst_161 = arith.constant dense<0.000000e+00> : vector<8xf32>
    %252 = vector.multi_reduction <add>, %251, %cst_161 [1] : vector<8x96xf32> to vector<8xf32>
    %253 = vector.shape_cast %252 : vector<8xf32> to vector<8x1xf32>
    %254 = arith.truncf %113 : vector<32x96xf32> to vector<32x96xbf16>
    %255 = arith.truncf %131 : vector<8x32xf32> to vector<8x32xbf16>
    %cst_162 = arith.constant dense<0.000000e+00> : vector<8x96xf32>
    %256 = tpu.matmul %255, %254, %cst_162 {dimension_numbers = #tpu.dot_dimension_numbers<[1], [0], [0], [1], [0, 0, 1, 1], [], []>} : vector<8x32xbf16>, vector<32x96xbf16>, vector<8x96xf32> -> vector<8x96xf32>
    %257 = vector.broadcast %148 : vector<8x1xf32> to vector<8x96xf32>
    %258 = vector.broadcast %112 : vector<1x96xf32> to vector<8x96xf32>
    %259 = arith.mulf %257, %258 : vector<8x96xf32>
    %260 = vector.broadcast %114 : vector<1x96xf32> to vector<8x96xf32>
    %261 = arith.addf %259, %260 : vector<8x96xf32>
    %262 = vector.extract_strided_slice %261 {offsets = [0, 0], sizes = [8, 64], strides = [1, 1]} : vector<8x96xf32> to vector<8x64xf32>
    %263 = vector.extract_strided_slice %256 {offsets = [0, 0], sizes = [8, 64], strides = [1, 1]} : vector<8x96xf32> to vector<8x64xf32>
    %264 = arith.addf %262, %263 : vector<8x64xf32>
    %cst_163 = arith.constant 5.000000e-01 : f32
    %265 = vector.broadcast %cst_163 : f32 to vector<8x64xf32>
    %266 = arith.mulf %265, %264 : vector<8x64xf32>
    %267 = math.tanh %266 : vector<8x64xf32>
    %cst_164 = arith.constant 5.000000e-01 : f32
    %268 = vector.broadcast %cst_164 : f32 to vector<8x64xf32>
    %269 = arith.mulf %268, %267 : vector<8x64xf32>
    %cst_165 = arith.constant 5.000000e-01 : f32
    %270 = vector.broadcast %cst_165 : f32 to vector<8x64xf32>
    %271 = arith.addf %269, %270 : vector<8x64xf32>
    %272 = vector.extract_strided_slice %271 {offsets = [0, 0], sizes = [8, 32], strides = [1, 1]} : vector<8x64xf32> to vector<8x32xf32>
    %273 = vector.extract_strided_slice %271 {offsets = [0, 32], sizes = [8, 32], strides = [1, 1]} : vector<8x64xf32> to vector<8x32xf32>
    %274 = vector.extract_strided_slice %261 {offsets = [0, 64], sizes = [8, 32], strides = [1, 1]} : vector<8x96xf32> to vector<8x32xf32>
    %275 = vector.extract_strided_slice %256 {offsets = [0, 64], sizes = [8, 32], strides = [1, 1]} : vector<8x96xf32> to vector<8x32xf32>
    %276 = arith.mulf %272, %275 : vector<8x32xf32>
    %277 = arith.addf %274, %276 : vector<8x32xf32>
    %278 = math.tanh %277 : vector<8x32xf32>
    %279 = arith.subf %131, %278 : vector<8x32xf32>
    %280 = arith.mulf %273, %279 : vector<8x32xf32>
    %281 = arith.addf %278, %280 : vector<8x32xf32>
    %282 = arith.truncf %281 : vector<8x32xf32> to vector<8x32xbf16>
    %cst_166 = arith.constant dense<0.000000e+00> : vector<8x96xf32>
    %283 = tpu.matmul %282, %254, %cst_166 {dimension_numbers = #tpu.dot_dimension_numbers<[1], [0], [0], [1], [0, 0, 1, 1], [], []>} : vector<8x32xbf16>, vector<32x96xbf16>, vector<8x96xf32> -> vector<8x96xf32>
    %284 = vector.broadcast %163 : vector<8x1xf32> to vector<8x96xf32>
    %285 = vector.broadcast %112 : vector<1x96xf32> to vector<8x96xf32>
    %286 = arith.mulf %284, %285 : vector<8x96xf32>
    %287 = vector.broadcast %114 : vector<1x96xf32> to vector<8x96xf32>
    %288 = arith.addf %286, %287 : vector<8x96xf32>
    %289 = vector.extract_strided_slice %288 {offsets = [0, 0], sizes = [8, 64], strides = [1, 1]} : vector<8x96xf32> to vector<8x64xf32>
    %290 = vector.extract_strided_slice %283 {offsets = [0, 0], sizes = [8, 64], strides = [1, 1]} : vector<8x96xf32> to vector<8x64xf32>
    %291 = arith.addf %289, %290 : vector<8x64xf32>
    %cst_167 = arith.constant 5.000000e-01 : f32
    %292 = vector.broadcast %cst_167 : f32 to vector<8x64xf32>
    %293 = arith.mulf %292, %291 : vector<8x64xf32>
    %294 = math.tanh %293 : vector<8x64xf32>
    %cst_168 = arith.constant 5.000000e-01 : f32
    %295 = vector.broadcast %cst_168 : f32 to vector<8x64xf32>
    %296 = arith.mulf %295, %294 : vector<8x64xf32>
    %cst_169 = arith.constant 5.000000e-01 : f32
    %297 = vector.broadcast %cst_169 : f32 to vector<8x64xf32>
    %298 = arith.addf %296, %297 : vector<8x64xf32>
    %299 = vector.extract_strided_slice %298 {offsets = [0, 0], sizes = [8, 32], strides = [1, 1]} : vector<8x64xf32> to vector<8x32xf32>
    %300 = vector.extract_strided_slice %298 {offsets = [0, 32], sizes = [8, 32], strides = [1, 1]} : vector<8x64xf32> to vector<8x32xf32>
    %301 = vector.extract_strided_slice %288 {offsets = [0, 64], sizes = [8, 32], strides = [1, 1]} : vector<8x96xf32> to vector<8x32xf32>
    %302 = vector.extract_strided_slice %283 {offsets = [0, 64], sizes = [8, 32], strides = [1, 1]} : vector<8x96xf32> to vector<8x32xf32>
    %303 = arith.mulf %299, %302 : vector<8x32xf32>
    %304 = arith.addf %301, %303 : vector<8x32xf32>
    %305 = math.tanh %304 : vector<8x32xf32>
    %306 = arith.subf %281, %305 : vector<8x32xf32>
    %307 = arith.mulf %300, %306 : vector<8x32xf32>
    %308 = arith.addf %305, %307 : vector<8x32xf32>
    %309 = arith.truncf %308 : vector<8x32xf32> to vector<8x32xbf16>
    %cst_170 = arith.constant dense<0.000000e+00> : vector<8x96xf32>
    %310 = tpu.matmul %309, %254, %cst_170 {dimension_numbers = #tpu.dot_dimension_numbers<[1], [0], [0], [1], [0, 0, 1, 1], [], []>} : vector<8x32xbf16>, vector<32x96xbf16>, vector<8x96xf32> -> vector<8x96xf32>
    %311 = vector.broadcast %178 : vector<8x1xf32> to vector<8x96xf32>
    %312 = vector.broadcast %112 : vector<1x96xf32> to vector<8x96xf32>
    %313 = arith.mulf %311, %312 : vector<8x96xf32>
    %314 = vector.broadcast %114 : vector<1x96xf32> to vector<8x96xf32>
    %315 = arith.addf %313, %314 : vector<8x96xf32>
    %316 = vector.extract_strided_slice %315 {offsets = [0, 0], sizes = [8, 64], strides = [1, 1]} : vector<8x96xf32> to vector<8x64xf32>
    %317 = vector.extract_strided_slice %310 {offsets = [0, 0], sizes = [8, 64], strides = [1, 1]} : vector<8x96xf32> to vector<8x64xf32>
    %318 = arith.addf %316, %317 : vector<8x64xf32>
    %cst_171 = arith.constant 5.000000e-01 : f32
    %319 = vector.broadcast %cst_171 : f32 to vector<8x64xf32>
    %320 = arith.mulf %319, %318 : vector<8x64xf32>
    %321 = math.tanh %320 : vector<8x64xf32>
    %cst_172 = arith.constant 5.000000e-01 : f32
    %322 = vector.broadcast %cst_172 : f32 to vector<8x64xf32>
    %323 = arith.mulf %322, %321 : vector<8x64xf32>
    %cst_173 = arith.constant 5.000000e-01 : f32
    %324 = vector.broadcast %cst_173 : f32 to vector<8x64xf32>
    %325 = arith.addf %323, %324 : vector<8x64xf32>
    %326 = vector.extract_strided_slice %325 {offsets = [0, 0], sizes = [8, 32], strides = [1, 1]} : vector<8x64xf32> to vector<8x32xf32>
    %327 = vector.extract_strided_slice %325 {offsets = [0, 32], sizes = [8, 32], strides = [1, 1]} : vector<8x64xf32> to vector<8x32xf32>
    %328 = vector.extract_strided_slice %315 {offsets = [0, 64], sizes = [8, 32], strides = [1, 1]} : vector<8x96xf32> to vector<8x32xf32>
    %329 = vector.extract_strided_slice %310 {offsets = [0, 64], sizes = [8, 32], strides = [1, 1]} : vector<8x96xf32> to vector<8x32xf32>
    %330 = arith.mulf %326, %329 : vector<8x32xf32>
    %331 = arith.addf %328, %330 : vector<8x32xf32>
    %332 = math.tanh %331 : vector<8x32xf32>
    %333 = arith.subf %308, %332 : vector<8x32xf32>
    %334 = arith.mulf %327, %333 : vector<8x32xf32>
    %335 = arith.addf %332, %334 : vector<8x32xf32>
    %336 = arith.truncf %335 : vector<8x32xf32> to vector<8x32xbf16>
    %cst_174 = arith.constant dense<0.000000e+00> : vector<8x96xf32>
    %337 = tpu.matmul %336, %254, %cst_174 {dimension_numbers = #tpu.dot_dimension_numbers<[1], [0], [0], [1], [0, 0, 1, 1], [], []>} : vector<8x32xbf16>, vector<32x96xbf16>, vector<8x96xf32> -> vector<8x96xf32>
    %338 = vector.broadcast %193 : vector<8x1xf32> to vector<8x96xf32>
    %339 = vector.broadcast %112 : vector<1x96xf32> to vector<8x96xf32>
    %340 = arith.mulf %338, %339 : vector<8x96xf32>
    %341 = vector.broadcast %114 : vector<1x96xf32> to vector<8x96xf32>
    %342 = arith.addf %340, %341 : vector<8x96xf32>
    %343 = vector.extract_strided_slice %342 {offsets = [0, 0], sizes = [8, 64], strides = [1, 1]} : vector<8x96xf32> to vector<8x64xf32>
    %344 = vector.extract_strided_slice %337 {offsets = [0, 0], sizes = [8, 64], strides = [1, 1]} : vector<8x96xf32> to vector<8x64xf32>
    %345 = arith.addf %343, %344 : vector<8x64xf32>
    %cst_175 = arith.constant 5.000000e-01 : f32
    %346 = vector.broadcast %cst_175 : f32 to vector<8x64xf32>
    %347 = arith.mulf %346, %345 : vector<8x64xf32>
    %348 = math.tanh %347 : vector<8x64xf32>
    %cst_176 = arith.constant 5.000000e-01 : f32
    %349 = vector.broadcast %cst_176 : f32 to vector<8x64xf32>
    %350 = arith.mulf %349, %348 : vector<8x64xf32>
    %cst_177 = arith.constant 5.000000e-01 : f32
    %351 = vector.broadcast %cst_177 : f32 to vector<8x64xf32>
    %352 = arith.addf %350, %351 : vector<8x64xf32>
    %353 = vector.extract_strided_slice %352 {offsets = [0, 0], sizes = [8, 32], strides = [1, 1]} : vector<8x64xf32> to vector<8x32xf32>
    %354 = vector.extract_strided_slice %352 {offsets = [0, 32], sizes = [8, 32], strides = [1, 1]} : vector<8x64xf32> to vector<8x32xf32>
    %355 = vector.extract_strided_slice %342 {offsets = [0, 64], sizes = [8, 32], strides = [1, 1]} : vector<8x96xf32> to vector<8x32xf32>
    %356 = vector.extract_strided_slice %337 {offsets = [0, 64], sizes = [8, 32], strides = [1, 1]} : vector<8x96xf32> to vector<8x32xf32>
    %357 = arith.mulf %353, %356 : vector<8x32xf32>
    %358 = arith.addf %355, %357 : vector<8x32xf32>
    %359 = math.tanh %358 : vector<8x32xf32>
    %360 = arith.subf %335, %359 : vector<8x32xf32>
    %361 = arith.mulf %354, %360 : vector<8x32xf32>
    %362 = arith.addf %359, %361 : vector<8x32xf32>
    %363 = arith.truncf %362 : vector<8x32xf32> to vector<8x32xbf16>
    %cst_178 = arith.constant dense<0.000000e+00> : vector<8x96xf32>
    %364 = tpu.matmul %363, %254, %cst_178 {dimension_numbers = #tpu.dot_dimension_numbers<[1], [0], [0], [1], [0, 0, 1, 1], [], []>} : vector<8x32xbf16>, vector<32x96xbf16>, vector<8x96xf32> -> vector<8x96xf32>
    %365 = vector.broadcast %208 : vector<8x1xf32> to vector<8x96xf32>
    %366 = vector.broadcast %112 : vector<1x96xf32> to vector<8x96xf32>
    %367 = arith.mulf %365, %366 : vector<8x96xf32>
    %368 = vector.broadcast %114 : vector<1x96xf32> to vector<8x96xf32>
    %369 = arith.addf %367, %368 : vector<8x96xf32>
    %370 = vector.extract_strided_slice %369 {offsets = [0, 0], sizes = [8, 64], strides = [1, 1]} : vector<8x96xf32> to vector<8x64xf32>
    %371 = vector.extract_strided_slice %364 {offsets = [0, 0], sizes = [8, 64], strides = [1, 1]} : vector<8x96xf32> to vector<8x64xf32>
    %372 = arith.addf %370, %371 : vector<8x64xf32>
    %cst_179 = arith.constant 5.000000e-01 : f32
    %373 = vector.broadcast %cst_179 : f32 to vector<8x64xf32>
    %374 = arith.mulf %373, %372 : vector<8x64xf32>
    %375 = math.tanh %374 : vector<8x64xf32>
    %cst_180 = arith.constant 5.000000e-01 : f32
    %376 = vector.broadcast %cst_180 : f32 to vector<8x64xf32>
    %377 = arith.mulf %376, %375 : vector<8x64xf32>
    %cst_181 = arith.constant 5.000000e-01 : f32
    %378 = vector.broadcast %cst_181 : f32 to vector<8x64xf32>
    %379 = arith.addf %377, %378 : vector<8x64xf32>
    %380 = vector.extract_strided_slice %379 {offsets = [0, 0], sizes = [8, 32], strides = [1, 1]} : vector<8x64xf32> to vector<8x32xf32>
    %381 = vector.extract_strided_slice %379 {offsets = [0, 32], sizes = [8, 32], strides = [1, 1]} : vector<8x64xf32> to vector<8x32xf32>
    %382 = vector.extract_strided_slice %369 {offsets = [0, 64], sizes = [8, 32], strides = [1, 1]} : vector<8x96xf32> to vector<8x32xf32>
    %383 = vector.extract_strided_slice %364 {offsets = [0, 64], sizes = [8, 32], strides = [1, 1]} : vector<8x96xf32> to vector<8x32xf32>
    %384 = arith.mulf %380, %383 : vector<8x32xf32>
    %385 = arith.addf %382, %384 : vector<8x32xf32>
    %386 = math.tanh %385 : vector<8x32xf32>
    %387 = arith.subf %362, %386 : vector<8x32xf32>
    %388 = arith.mulf %381, %387 : vector<8x32xf32>
    %389 = arith.addf %386, %388 : vector<8x32xf32>
    %390 = arith.truncf %389 : vector<8x32xf32> to vector<8x32xbf16>
    %cst_182 = arith.constant dense<0.000000e+00> : vector<8x96xf32>
    %391 = tpu.matmul %390, %254, %cst_182 {dimension_numbers = #tpu.dot_dimension_numbers<[1], [0], [0], [1], [0, 0, 1, 1], [], []>} : vector<8x32xbf16>, vector<32x96xbf16>, vector<8x96xf32> -> vector<8x96xf32>
    %392 = vector.broadcast %223 : vector<8x1xf32> to vector<8x96xf32>
    %393 = vector.broadcast %112 : vector<1x96xf32> to vector<8x96xf32>
    %394 = arith.mulf %392, %393 : vector<8x96xf32>
    %395 = vector.broadcast %114 : vector<1x96xf32> to vector<8x96xf32>
    %396 = arith.addf %394, %395 : vector<8x96xf32>
    %397 = vector.extract_strided_slice %396 {offsets = [0, 0], sizes = [8, 64], strides = [1, 1]} : vector<8x96xf32> to vector<8x64xf32>
    %398 = vector.extract_strided_slice %391 {offsets = [0, 0], sizes = [8, 64], strides = [1, 1]} : vector<8x96xf32> to vector<8x64xf32>
    %399 = arith.addf %397, %398 : vector<8x64xf32>
    %cst_183 = arith.constant 5.000000e-01 : f32
    %400 = vector.broadcast %cst_183 : f32 to vector<8x64xf32>
    %401 = arith.mulf %400, %399 : vector<8x64xf32>
    %402 = math.tanh %401 : vector<8x64xf32>
    %cst_184 = arith.constant 5.000000e-01 : f32
    %403 = vector.broadcast %cst_184 : f32 to vector<8x64xf32>
    %404 = arith.mulf %403, %402 : vector<8x64xf32>
    %cst_185 = arith.constant 5.000000e-01 : f32
    %405 = vector.broadcast %cst_185 : f32 to vector<8x64xf32>
    %406 = arith.addf %404, %405 : vector<8x64xf32>
    %407 = vector.extract_strided_slice %406 {offsets = [0, 0], sizes = [8, 32], strides = [1, 1]} : vector<8x64xf32> to vector<8x32xf32>
    %408 = vector.extract_strided_slice %406 {offsets = [0, 32], sizes = [8, 32], strides = [1, 1]} : vector<8x64xf32> to vector<8x32xf32>
    %409 = vector.extract_strided_slice %396 {offsets = [0, 64], sizes = [8, 32], strides = [1, 1]} : vector<8x96xf32> to vector<8x32xf32>
    %410 = vector.extract_strided_slice %391 {offsets = [0, 64], sizes = [8, 32], strides = [1, 1]} : vector<8x96xf32> to vector<8x32xf32>
    %411 = arith.mulf %407, %410 : vector<8x32xf32>
    %412 = arith.addf %409, %411 : vector<8x32xf32>
    %413 = math.tanh %412 : vector<8x32xf32>
    %414 = arith.subf %389, %413 : vector<8x32xf32>
    %415 = arith.mulf %408, %414 : vector<8x32xf32>
    %416 = arith.addf %413, %415 : vector<8x32xf32>
    %417 = arith.truncf %416 : vector<8x32xf32> to vector<8x32xbf16>
    %cst_186 = arith.constant dense<0.000000e+00> : vector<8x96xf32>
    %418 = tpu.matmul %417, %254, %cst_186 {dimension_numbers = #tpu.dot_dimension_numbers<[1], [0], [0], [1], [0, 0, 1, 1], [], []>} : vector<8x32xbf16>, vector<32x96xbf16>, vector<8x96xf32> -> vector<8x96xf32>
    %419 = vector.broadcast %238 : vector<8x1xf32> to vector<8x96xf32>
    %420 = vector.broadcast %112 : vector<1x96xf32> to vector<8x96xf32>
    %421 = arith.mulf %419, %420 : vector<8x96xf32>
    %422 = vector.broadcast %114 : vector<1x96xf32> to vector<8x96xf32>
    %423 = arith.addf %421, %422 : vector<8x96xf32>
    %424 = vector.extract_strided_slice %423 {offsets = [0, 0], sizes = [8, 64], strides = [1, 1]} : vector<8x96xf32> to vector<8x64xf32>
    %425 = vector.extract_strided_slice %418 {offsets = [0, 0], sizes = [8, 64], strides = [1, 1]} : vector<8x96xf32> to vector<8x64xf32>
    %426 = arith.addf %424, %425 : vector<8x64xf32>
    %cst_187 = arith.constant 5.000000e-01 : f32
    %427 = vector.broadcast %cst_187 : f32 to vector<8x64xf32>
    %428 = arith.mulf %427, %426 : vector<8x64xf32>
    %429 = math.tanh %428 : vector<8x64xf32>
    %cst_188 = arith.constant 5.000000e-01 : f32
    %430 = vector.broadcast %cst_188 : f32 to vector<8x64xf32>
    %431 = arith.mulf %430, %429 : vector<8x64xf32>
    %cst_189 = arith.constant 5.000000e-01 : f32
    %432 = vector.broadcast %cst_189 : f32 to vector<8x64xf32>
    %433 = arith.addf %431, %432 : vector<8x64xf32>
    %434 = vector.extract_strided_slice %433 {offsets = [0, 0], sizes = [8, 32], strides = [1, 1]} : vector<8x64xf32> to vector<8x32xf32>
    %435 = vector.extract_strided_slice %433 {offsets = [0, 32], sizes = [8, 32], strides = [1, 1]} : vector<8x64xf32> to vector<8x32xf32>
    %436 = vector.extract_strided_slice %423 {offsets = [0, 64], sizes = [8, 32], strides = [1, 1]} : vector<8x96xf32> to vector<8x32xf32>
    %437 = vector.extract_strided_slice %418 {offsets = [0, 64], sizes = [8, 32], strides = [1, 1]} : vector<8x96xf32> to vector<8x32xf32>
    %438 = arith.mulf %434, %437 : vector<8x32xf32>
    %439 = arith.addf %436, %438 : vector<8x32xf32>
    %440 = math.tanh %439 : vector<8x32xf32>
    %441 = arith.subf %416, %440 : vector<8x32xf32>
    %442 = arith.mulf %435, %441 : vector<8x32xf32>
    %443 = arith.addf %440, %442 : vector<8x32xf32>
    %444 = arith.truncf %443 : vector<8x32xf32> to vector<8x32xbf16>
    %cst_190 = arith.constant dense<0.000000e+00> : vector<8x96xf32>
    %445 = tpu.matmul %444, %254, %cst_190 {dimension_numbers = #tpu.dot_dimension_numbers<[1], [0], [0], [1], [0, 0, 1, 1], [], []>} : vector<8x32xbf16>, vector<32x96xbf16>, vector<8x96xf32> -> vector<8x96xf32>
    %446 = vector.broadcast %253 : vector<8x1xf32> to vector<8x96xf32>
    %447 = vector.broadcast %112 : vector<1x96xf32> to vector<8x96xf32>
    %448 = arith.mulf %446, %447 : vector<8x96xf32>
    %449 = vector.broadcast %114 : vector<1x96xf32> to vector<8x96xf32>
    %450 = arith.addf %448, %449 : vector<8x96xf32>
    %451 = vector.extract_strided_slice %450 {offsets = [0, 0], sizes = [8, 64], strides = [1, 1]} : vector<8x96xf32> to vector<8x64xf32>
    %452 = vector.extract_strided_slice %445 {offsets = [0, 0], sizes = [8, 64], strides = [1, 1]} : vector<8x96xf32> to vector<8x64xf32>
    %453 = arith.addf %451, %452 : vector<8x64xf32>
    %cst_191 = arith.constant 5.000000e-01 : f32
    %454 = vector.broadcast %cst_191 : f32 to vector<8x64xf32>
    %455 = arith.mulf %454, %453 : vector<8x64xf32>
    %456 = math.tanh %455 : vector<8x64xf32>
    %cst_192 = arith.constant 5.000000e-01 : f32
    %457 = vector.broadcast %cst_192 : f32 to vector<8x64xf32>
    %458 = arith.mulf %457, %456 : vector<8x64xf32>
    %cst_193 = arith.constant 5.000000e-01 : f32
    %459 = vector.broadcast %cst_193 : f32 to vector<8x64xf32>
    %460 = arith.addf %458, %459 : vector<8x64xf32>
    %461 = vector.extract_strided_slice %460 {offsets = [0, 0], sizes = [8, 32], strides = [1, 1]} : vector<8x64xf32> to vector<8x32xf32>
    %462 = vector.extract_strided_slice %460 {offsets = [0, 32], sizes = [8, 32], strides = [1, 1]} : vector<8x64xf32> to vector<8x32xf32>
    %463 = vector.extract_strided_slice %450 {offsets = [0, 64], sizes = [8, 32], strides = [1, 1]} : vector<8x96xf32> to vector<8x32xf32>
    %464 = vector.extract_strided_slice %445 {offsets = [0, 64], sizes = [8, 32], strides = [1, 1]} : vector<8x96xf32> to vector<8x32xf32>
    %465 = arith.mulf %461, %464 : vector<8x32xf32>
    %466 = arith.addf %463, %465 : vector<8x32xf32>
    %467 = math.tanh %466 : vector<8x32xf32>
    %468 = arith.subf %443, %467 : vector<8x32xf32>
    %469 = arith.mulf %462, %468 : vector<8x32xf32>
    %470 = arith.addf %467, %469 : vector<8x32xf32>
    %cst_194 = arith.constant 0.000000e+00 : f32
    %471 = vector.broadcast %cst_194 : f32 to vector<8x32xf32>
    %472 = arith.maximumf %470, %471 : vector<8x32xf32>
    %473 = vector.broadcast %115 : vector<1x32xf32> to vector<8x32xf32>
    %474 = arith.mulf %472, %473 : vector<8x32xf32>
    %cst_195 = arith.constant dense<0.000000e+00> : vector<8xf32>
    %475 = vector.multi_reduction <add>, %474, %cst_195 [1] : vector<8x32xf32> to vector<8xf32>
    %476 = vector.shape_cast %475 : vector<8xf32> to vector<8x1xf32>
    %477 = vector.broadcast %116 : vector<1x1xf32> to vector<8x1xf32>
    %478 = arith.addf %476, %477 : vector<8x1xf32>
    %c0_196 = arith.constant 0 : index
    %c0_197 = arith.constant 0 : index
    %479 = vector.load %arg6[%c0_196, %c0_197] : memref<8x1xf32, #tpu.memory_space<vmem>>, vector<8x1xf32>
    tpu.vector_store %arg6[%c0_196, %c0_197], %478 {strides = array<i32>} : memref<8x1xf32, #tpu.memory_space<vmem>>, vector<8x1xf32>,
    return
  }
}

</mosaic_0001>

<bundles_post_ra>
// kernel: personalize_lstm_forward.1
= control target key start
LH: loop header
LB: loop body
LE: loop exit
PB: predicated region body
PF: predicated region fallthrough
CT: control target
= control target key end

     0   :  { %11 = vsyncpa [#allocation7], 0  ;;  %s1326_s0 = inlined_call_operand.vmem [shape: s32[8,3], index: 0, kind: input, shape index: {}, may-alias: {0,1}]   ;;  %s1327_s1 = inlined_call_operand.vmem [shape: s32[8,1], index: 1, kind: input, shape index: {}, may-alias: {0,1}]   ;;  %s1328_s2 = inlined_call_operand.hbm [shape: f32[256,96], index: 2, kind: input, shape index: {}]   ;;  %s1329_s3 = inlined_call_operand.hbm [shape: f32[16,16], index: 3, kind: input, shape index: {}]   ;;  %s1330_s4 = inlined_call_operand.vmem [shape: f32[16,16], index: 4, kind: input, shape index: {}]   ;;  %s1331_s5 = inlined_call_operand.hbm [shape: f32[128,128], index: 5, kind: input, shape index: {}]   ;;  %s1332_s6 = inlined_call_operand.vmem [shape: f32[8,1], index: 6, kind: output, shape index: {}]  }
   0x1   :  { %12 = vsyncpa [#allocation6], 0 }
   0x2   :  { %13 = vsyncpa [#allocation10], 0  ;;  %s42_s23 = sshll.u32 %s1329_s3, 4  ;;  %s1026_s24 = smov [#allocation9]   ;;  %s43_s23 = int_to_ptr.hbm [resolvable:$true] %s42_s23 }
   0x3   :  { %s44_s25 = sshll.u32 %s1026_s24, 4  ;;  %s19_s28 = sshll.u32 %s1326_s0, 4  ;;  %s45_s25 = int_to_ptr.vmem [resolvable:$true] %s44_s25  ;;  %s20_s28 = int_to_ptr.vmem [resolvable:$true] %s19_s28 }
   0x4   :  { %s1027_s29 = smov 128   ;;  %s1028_s30 = smov 8  }
   0x5   :  { %50 = dma.hbm_to_vmem [thread:$0]  %s43_s23, 256, %s45_s25, [#allocation10], %s1027_s29, %s1027_s29, %s1028_s30  }
   0x6   :  { %s1029_s7 = smov [#allocation5]   ;;  %s29_s10 = sshll.u32 %s1328_s2, 4  ;;  %s30_s10 = int_to_ptr.hbm [resolvable:$true] %s29_s10 }
   0x7   :  { %22 = dma.vmem_to_smem %s20_s28, 128, %s1029_s7, [#allocation7]  }
   0x8   :  { %s1030_s3 = smov [#allocation8]   ;;  %s57_s14 = sshll.u32 %s1331_s5, 4  ;;  %s58_s14 = int_to_ptr.hbm [resolvable:$true] %s57_s14 }
   0x9   :  { %s31_s11 = sshll.u32 %s1030_s3, 4  ;;  %s1031_s0 = smov [#allocation11]   ;;  %s32_s11 = int_to_ptr.vmem [resolvable:$true] %s31_s11 }
   0xa   :  { %37 = dma.hbm_to_vmem [thread:$0]  %s30_s10, 4096, %s32_s11, [#allocation6], %s1027_s29, %s1027_s29, %s1028_s30  }
   0xb   :  { %s59_s15 = sshll.u32 %s1031_s0, 4  ;;  %s60_s15 = int_to_ptr.vmem [resolvable:$true] %s59_s15 }
   0xc   :  { %65 = dma.hbm_to_vmem [thread:$0]  %s58_s14, 2048, %s60_s15, [#allocation10], %s1027_s29, %s1027_s29, %s1028_s30  }
   0xd   :  { %1020 = dma.done.wait [#allocation7], 128  }
   0xe   :  { %1021 = vsyncadd [#allocation7], 4294967168 }
   0xf   :  { %1022 = dma.done.wait [#allocation6], 4096  }
  0x10   :  { %1023 = vsyncadd [#allocation6], 4294963200 }
  0x11   :  { %1024 = dma.done.wait [#allocation10], 2304  }
  0x12   :  { %1025 = vsyncadd [#allocation10], 4294964992 }
  0x13   :  { %82 = sfence }
  0x14   :  { %v195_v0 = vld [vmem:[#allocation11 + $0x10] sm:$0xff]  ;;  %v196_v1 = vld [vmem:[#allocation11 + $0x18] sm:$0xff]  ;;  %v193_v2 = vld [vmem:[#allocation11] sm:$0xff]  ;;  %s1084_s2 = sld [smem:[#allocation5 + $0x2]]  ;;  %vm94_vm0 = vcmask 122880   ;;  %vm213_vm1 = vcmask 130048   ;;  %v269_v55 = vlaneseq }
  0x15   :  { %v212_v3 = vpack.c.bf16 %v196_v1, %v195_v0  ;;  %v194_v4 = vld [vmem:[#allocation11 + $0x8] sm:$0xff]  ;;  %s1086_s5 = sld [smem:[#allocation5 + $0x82]]  ;;  %v199_v27 = vld [vmem:[#allocation11 + $0x30] sm:$0xff]  ;;  %v1189_v30 = vld [vmem:[%s1327_s1] sm:$0xff]  ;;  %v1032_v33 = vmov 0   ;;  %vm90_vm3 = vcmask 778240  }
  0x16   :  { %v210_v5 = vpack.c.bf16 %v194_v4, %v193_v2  ;;  %s1088_s16 = sld [smem:[#allocation5 + $0x102]]  ;;  %v198_v26 = vld [vmem:[#allocation11 + $0x28] sm:$0xff]  ;;  %v204_v31 = vld [vmem:[#allocation11 + $0x58] sm:$0xff]  ;;  %v205_v32 = vld [vmem:[#allocation11 + $0x60] sm:$0xff]  ;;  %893 = vset.pattern.permute.xlu0 %v1032_v33  ;;  %v866_v34 = vadd.s32 4294967289, %v1189_v30  ;;  %894 = vset.pattern.permute.xlu1 %v1032_v33  ;;  %v1206_v58 = vand.u32 127, %v269_v55 }
  0x17   :  { %224 = vmatpush.bf16.msra.mxu0 %v212_v3  ;;  %s1090_s17 = sld [smem:[#allocation5 + $0x182]]  ;;  %v250_v28 = vpack.c.bf16 %v199_v27, %v198_v26  ;;  %v377_v35 = vpack.c.bf16 %v205_v32, %v204_v31  ;;  %895 = vset.pattern.permute.xlu2 %v1032_v33  ;;  %v896_v39 = vld [vmem:[#allocation11 + $0x20] ss:$0 sm:$0xff]  ;;  %v202_v46 = vld [vmem:[#allocation11 + $0x48] sm:$0xff]  ;;  %v203_v47 = vld [vmem:[#allocation11 + $0x50] sm:$0xff]  ;;  %v1033_v60 = vmov 0.0  }
  0x18   :  { %240 = vmatpush.bf16.msra.mxu1 %v210_v5  ;;  %s1092_s18 = sld [smem:[#allocation5 + $0x202]]  ;;  %vm272_vm2 = vcmp.lt.s32.totalorder %v866_v34, 0  ;;  %v273_v36 = vadd.s32 96, %v866_v34  ;;  %v376_v48 = vpack.c.bf16 %v203_v47, %v202_v46  ;;  %vm281_vm5 = vcmask 785408   ;;  %v897_v1 = vld [vmem:[#allocation11 + $0x38] ss:$0 sm:$0xff] }
  0x19   :  { %s1094_s19 = sld [smem:[#allocation5 + $0x282]]  ;;  %262 = vmatpush.bf16.msra.mxu2 %v250_v28  ;;  %389 = vmatpush.bf16.msra.mxu3 %v377_v35  ;;  %vm379_vm6 = vcmask 261120   ;;  %v867_v26 = vadd.s32 4294967290, %v1189_v30 }
  0x1a   :  { %s96_s22 = scalar_lea.vmem %s1330_s4, %s1084_s2  ;;  %s1100_s23 = sld [smem:[#allocation5 + $0x302]]  ;;  %v274_v38 = vsel %vm272_vm2, %v273_v36, %v866_v34 }
  0x1b   :  { %v97_v6 = vld [vmem:[%s96_s22] sm:$0x1]  ;;  %s109_s26 = scalar_lea.vmem %s1330_s4, %s1086_s5  ;;  %s1106_s27 = sld [smem:[#allocation5 + $0x382]]  ;;  %444 = vmatpush.bf16.msrb.mxu0 %v377_v35  ;;  %276 = vperm.xlu0 %893, %v274_v38   ;;  %v287_v28 = vadd.s32 96, %v867_v26  ;;  %vm286_vm7 = vcmp.lt.s32.totalorder %v867_v26, 0 }
  0x1c   :  { %98 = vst.msk [vmem:[#allocation4] sm:$0x1] %vm94_vm0, %v97_v6  ;;  %v110_v7 = vld [vmem:[%s109_s26] sm:$0x1]  ;;  %s122_s30 = scalar_lea.vmem %s1330_s4, %s1088_s16  ;;  %s839_s7 = sld [smem:[#allocation5 + $0x1]]  ;;  %493 = vmatpush.bf16.msrb.mxu1 %v377_v35 }
  0x1d   :  { %111 = vst.msk [vmem:[#allocation4 + $0x1] sm:$0x1] %vm94_vm0, %v110_v7  ;;  %v123_v8 = vld [vmem:[%s122_s30] sm:$0x1]  ;;  %s135_s10 = scalar_lea.vmem %s1330_s4, %s1090_s17  ;;  %s842_s3 = sld [smem:[#allocation5 + $0x81]]  ;;  %542 = vmatpush.bf16.msrb.mxu2 %v377_v35  ;;  %390 = vmatpush.bf16.msra.mxu3 %v376_v48 }
  0x1e   :  { %124 = vst.msk [vmem:[#allocation4 + $0x2] sm:$0x1] %vm94_vm0, %v123_v8  ;;  %v136_v9 = vld [vmem:[%s135_s10] sm:$0x1]  ;;  %s148_s13 = scalar_lea.vmem %s1330_s4, %s1092_s18  ;;  %s1123_s14 = sld [smem:[#allocation5 + $0x101]] }
  0x1f   :  { %137 = vst.msk [vmem:[#allocation4 + $0x3] sm:$0x1] %vm94_vm0, %v136_v9  ;;  %v149_v10 = vld [vmem:[%s148_s13] sm:$0x1]  ;;  %s161_s20 = scalar_lea.vmem %s1330_s4, %s1094_s19  ;;  %s1135_s25 = sld [smem:[#allocation5 + $0x181]]  ;;  %445 = vmatpush.bf16.msrb.mxu0 %v376_v48 }
  0x20   :  { %150 = vst.msk [vmem:[#allocation4 + $0x4] sm:$0x1] %vm94_vm0, %v149_v10  ;;  %v162_v11 = vld [vmem:[%s161_s20] sm:$0x1]  ;;  %s174_s24 = scalar_lea.vmem %s1330_s4, %s1100_s23  ;;  %s1142_s30 = sld [smem:[#allocation5 + $0x201]]  ;;  %494 = vmatpush.bf16.msrb.mxu1 %v376_v48 }
  0x21   :  { %163 = vst.msk [vmem:[#allocation4 + $0x5] sm:$0x1] %vm94_vm0, %v162_v11  ;;  %v175_v12 = vld [vmem:[%s174_s24] sm:$0x1]  ;;  %s187_s29 = scalar_lea.vmem %s1330_s4, %s1106_s27  ;;  %s854_s12 = sld [smem:[#allocation5 + $0x281]]  ;;  %543 = vmatpush.bf16.msrb.mxu2 %v376_v48  ;;  %591 = vmatpush.bf16.msrb.mxu3 %v377_v35 }
  0x22   :  { %176 = vst.msk [vmem:[#allocation4 + $0x6] sm:$0x1] %vm94_vm0, %v175_v12  ;;  %v188_v13 = vld [vmem:[%s187_s29] sm:$0x1]  ;;  %s841_s8 = sshll.u32 %s839_s7, 4  ;;  %s92_s10 = scalar_lea.vmem [#allocation9], %s839_s7 }
  0x23   :  { %189 = vst.msk [vmem:[#allocation4 + $0x7] sm:$0x1] %vm94_vm0, %v188_v13  ;;  %s1147_s9 = sadd.s32 %s841_s8, %s1084_s2  ;;  %v93_v14 = vld [vmem:[%s92_s10] sm:$0x1]  ;;  %s844_s11 = sshll.u32 %s842_s3, 4 }
  0x24   :  { %95 = vst.msk [vmem:[#allocation3] sm:$0x1] %vm94_vm0, %v93_v14  ;;  %s1151_s4 = sadd.s32 %s844_s11, %s1086_s5  ;;  %s106_s13 = scalar_lea.vmem [#allocation9], %s842_s3  ;;  %v1219_v8 = vld [vmem:[#allocation11 + $0x40] ss:$0 sm:$0xff] }
  0x25   :  { %v107_v15 = vld [vmem:[%s106_s13] sm:$0x1]  ;;  %s847_s0 = sshll.u32 %s1123_s14, 4  ;;  %s119_s15 = scalar_lea.vmem [#allocation9], %s1123_s14  ;;  %592 = vmatpush.bf16.msrb.mxu3 %v376_v48  ;;  %v1221_v10 = vld [vmem:[#allocation11 + $0x68] ss:$0 sm:$0xff] }
  0x26   :  { %108 = vst.msk [vmem:[#allocation3 + $0x1] sm:$0x1] %vm94_vm0, %v107_v15  ;;  %s1156_s2 = sadd.s32 %s847_s0, %s1088_s16  ;;  %v120_v16 = vld [vmem:[%s119_s15] sm:$0x1]  ;;  %s850_s7 = sshll.u32 %s1135_s25, 4 }
  0x27   :  { %121 = vst.msk [vmem:[#allocation3 + $0x2] sm:$0x1] %vm94_vm0, %v120_v16  ;;  %s1162_s20 = sadd.s32 %s850_s7, %s1090_s17  ;;  %s132_s5 = scalar_lea.vmem [#allocation9], %s1135_s25 }
  0x28   :  { %v133_v18 = vld [vmem:[%s132_s5] sm:$0x1]  ;;  %s853_s3 = sshll.u32 %s1142_s30, 4  ;;  %s145_s16 = scalar_lea.vmem [#allocation9], %s1142_s30 }
  0x29   :  { %134 = vst.msk [vmem:[#allocation3 + $0x3] sm:$0x1] %vm94_vm0, %v133_v18  ;;  %s1168_s21 = sadd.s32 %s853_s3, %s1092_s18  ;;  %v146_v20 = vld [vmem:[%s145_s16] sm:$0x1]  ;;  %s856_s14 = sshll.u32 %s854_s12, 4 }
  0x2a   :  { %v192_v17 = vld [vmem:[#allocation4] sm:$0xff]  ;;  %147 = vst.msk [vmem:[#allocation3 + $0x4] sm:$0x1] %vm94_vm0, %v146_v20  ;;  %s1174_s17 = sadd.s32 %s856_s14, %s1094_s19  ;;  %s158_s22 = scalar_lea.vmem [#allocation9], %s854_s12 }
  0x2b   :  { %v211_v19 = vpack.c.bf16 %v192_v17, %v192_v17  ;;  %v159_v21 = vld [vmem:[%s158_s22] sm:$0x1]  ;;  %s857_s24 = sld [smem:[#allocation5 + $0x301]]  ;;  %s88_s1 = scalar_lea.vmem [#allocation8], %s1147_s9 }
  0x2c   :  { %160 = vst.msk [vmem:[#allocation3 + $0x5] sm:$0x1] %vm94_vm0, %v159_v21  ;;  %s860_s25 = sld [smem:[#allocation5 + $0x381]]  ;;  %v89_v49 = vld [vmem:[%s88_s1] sm:$0x1]  ;;  %s116_s10 = scalar_lea.vmem [#allocation8], %s1156_s2 }
  0x2d   :  { %863 = vmatmul.msk.bf16.vlgmr.msra.gmra.mxu0 %vm213_vm1, %v211_v19  ;;  %v117_v51 = vld [vmem:[%s116_s10] sm:$0x1]  ;;  %s129_s11 = scalar_lea.vmem [#allocation8], %s1162_s20  ;;  %91 = vst.msk [vmem:[#allocation2] sm:$0x1] %vm90_vm3, %v89_v49  ;;  %s142_s9 = scalar_lea.vmem [#allocation8], %s1168_s21 }
  0x2e   :  { %640 = vmatpush.bf16.msra.mxu0 %v377_v35  ;;  %v130_v52 = vld [vmem:[%s129_s11] sm:$0x1]  ;;  %s155_s12 = scalar_lea.vmem [#allocation8], %s1174_s17  ;;  %118 = vst.msk [vmem:[#allocation2 + $0x2] sm:$0x1] %vm90_vm3, %v117_v51  ;;  %s1034_s0 = smov 64  }
  0x2f   :  { %v143_v53 = vld [vmem:[%s142_s9] sm:$0x1]  ;;  %131 = vst.msk [vmem:[#allocation2 + $0x3] sm:$0x1] %vm90_vm3, %v130_v52  ;;  %s1035_s2 = smov 32   ;;  %s1036_s15 = smov 96  }
  0x30   :  { %v156_v54 = vld [vmem:[%s155_s12] sm:$0x1]  ;;  %144 = vst.msk [vmem:[#allocation2 + $0x4] sm:$0x1] %vm90_vm3, %v143_v53 }
  0x31   :  { %s859_s26 = sshll.u32 %s857_s24, 4  ;;  %s171_s18 = scalar_lea.vmem [#allocation9], %s857_s24  ;;  %157 = vst.msk [vmem:[#allocation2 + $0x5] sm:$0x1] %vm90_vm3, %v156_v54 }
  0x32   :  { %s1178_s28 = sadd.s32 %s859_s26, %s1100_s23  ;;  %v172_v22 = vld [vmem:[%s171_s18] sm:$0x1]  ;;  %s862_s29 = sshll.u32 %s860_s25, 4  ;;  %641 = vmatpush.bf16.msra.mxu0 %v376_v48 }
  0x33   :  { %173 = vst.msk [vmem:[#allocation3 + $0x6] sm:$0x1] %vm94_vm0, %v172_v22  ;;  %s1182_s30 = sadd.s32 %s862_s29, %s1106_s27  ;;  %s184_s8 = scalar_lea.vmem [#allocation9], %s860_s25 }
  0x34   :  { %v185_v23 = vld [vmem:[%s184_s8] sm:$0x1]  ;;  %s103_s27 = scalar_lea.vmem [#allocation8], %s1151_s4  ;;  %s168_s4 = scalar_lea.vmem [#allocation8], %s1178_s28 }
  0x35   :  { %186 = vst.msk [vmem:[#allocation3 + $0x7] sm:$0x1] %vm94_vm0, %v185_v23  ;;  %v104_v50 = vld [vmem:[%s103_s27] sm:$0x1]  ;;  %s181_s13 = scalar_lea.vmem [#allocation8], %s1182_s30 }
  0x36   :  { %105 = vst.msk [vmem:[#allocation2 + $0x1] sm:$0x1] %vm90_vm3, %v104_v50  ;;  %v169_v56 = vld [vmem:[%s168_s4] sm:$0x1] }
  0x37   :  { %v182_v57 = vld [vmem:[%s181_s13] sm:$0x1]  ;;  %170 = vst.msk [vmem:[#allocation2 + $0x6] sm:$0x1] %vm90_vm3, %v169_v56 }
  0x38   :  { %183 = vst.msk [vmem:[#allocation2 + $0x7] sm:$0x1] %vm90_vm3, %v182_v57 }
  0x3c   :  { %v191_v24 = vld [vmem:[#allocation3] sm:$0xff] }
  0x3d   :  { %v209_v25 = vpack.c.bf16 %v191_v24, %v191_v24 }
  0x3f   :  { %864 = vmatmul.msk.bf16.vlgmr.msra.gmra.mxu1 %vm213_vm1, %v209_v25  ;;  %v1213_v62 = vld [vmem:[#allocation2] sm:$0xff] }
  0x40   :  { %689 = vmatpush.bf16.msra.mxu1 %v377_v35 }
  0x44   :  { %690 = vmatpush.bf16.msra.mxu1 %v376_v48 }
  0x8d   :  { %v277_v59 = vpop.permute.xlu0 %276 }
  0x8e   :  { %vm278_vm4 = vcmp.eq.s32.totalorder %v1206_v58, %v277_v59 }
  0x8f   :  { %v279_v61 = vsel %vm278_vm4, 1.0, %v1033_v60 }
  0x90   :  { %v280_v63 = vmul.f32 %v279_v61, %v1213_v62  ;;  %v868_v61 = vadd.s32 4294967291, %v1189_v30 }
  0x92   :  { %v282_v0 = vsel %vm281_vm5, %v280_v63, 0.0  ;;  %vm299_vm9 = vcmp.lt.s32.totalorder %v868_v61, 0 }
  0x93   :  { %283 = vadd.xlane.f32.xlu0 %v282_v0  ;;  %v300_v0 = vadd.s32 96, %v868_v61 }
  0xaa   :  { %v226_v29 = vpop.f32.mrf.mxu0 }
  0xb2   :  { %v228_v37 = vpop.f32.mrf.mxu0 }
  0xbc   :  { %v242_v40 = vpop.f32.mrf.mxu1 }
  0xbd   :  { %v243_v41 = vadd.f32 %v242_v40, %v226_v29  ;;  %v288_v29 = vsel %vm286_vm7, %v287_v28, %v867_v26  ;;  %v869_v26 = vadd.s32 4294967292, %v1189_v30 }
  0xbf   :  { %v247_v42 = vadd.f32 %v896_v39, %v243_v41  ;;  %v313_v28 = vadd.s32 96, %v869_v26  ;;  %vm312_vm11 = vcmp.lt.s32.totalorder %v869_v26, 0 }
  0xc1   :  { %902 = vtanh.f32 %v247_v42 }
  0xc4   :  { %v244_v43 = vpop.f32.mrf.mxu1 }
  0xc7   :  { %v903_v44 = vpop.eup %902 }
  0xc8   :  { %v249_v45 = vpack.c.bf16 %v903_v44, %v903_v44 }
  0xca   :  { %865 = vmatmul.msk.bf16.vlgmr.msra.gmra.mxu2 %vm213_vm1, %v249_v45 }
  0xcb   :  { %738 = vmatpush.bf16.msra.mxu2 %v377_v35 }
  0xcf   :  { %739 = vmatpush.bf16.msra.mxu2 %v376_v48 }
 0x106   :  { %v284_v9 = vpop.xlane.xlu0 %283 }
 0x107   :  { %v397_v11 = vmul.f32 %v1219_v8, %v284_v9 }
 0x109   :  { %v399_v12 = vadd.f32 %v1221_v10, %v397_v11 }
 0x14d   :  { %v264_v2 = vpop.f32.mrf.mxu2 }
 0x14e   :  { %v265_v3 = vadd.f32 %v897_v1, %v264_v2  ;;  %v301_v1 = vsel %vm299_vm9, %v300_v0, %v868_v61 }
 0x150   :  { %v378_v4 = vpack.c.bf16 %v265_v3, %v265_v3 }
 0x152   :  { %874 = vmatmul.msk.bf16.vlgmr.msra.gmra.mxu3 %vm379_vm6, %v378_v4 }
 0x155   :  { %v266_v5 = vpop.f32.mrf.mxu2 }
 0x1d5   :  { %v392_v6 = vpop.f32.mrf.mxu3 }
 0x1d6   :  { %406 = vrot.lane.b32.xlu1 %v392_v6, %s1034_s0  ;;  %v400_v13 = vadd.f32 %v399_v12, %v392_v6 }
 0x1d8   :  { %v401_v14 = vmul.f32 0.5, %v400_v13 }
 0x1da   :  { %904 = vtanh.f32 %v401_v14 }
 0x1dd   :  { %v394_v7 = vpop.f32.mrf.mxu3 }
 0x1e0   :  { %v905_v15 = vpop.eup %904 }
 0x1e1   :  { %v403_v16 = vmul.f32 0.5, %v905_v15 }
 0x1e3   :  { %v404_v17 = vadd.f32 0.5, %v403_v16 }
 0x248   :  { %v407_v18 = vpop.permute.xlu1 %406 }
 0x249   :  { %v409_v19 = vmul.f32 %v407_v18, %v404_v17 }
 0x24b   :  { %411 = vrot.lane.b32.xlu1 %v409_v19, %s1034_s0 }
 0x2bd   :  { %v412_v20 = vpop.permute.xlu1 %411 }
 0x2be   :  { %v414_v21 = vadd.f32 %v412_v20, %v399_v12 }
 0x2c0   :  { %906 = vtanh.f32 %v414_v21 }
 0x2c6   :  { %v907_v22 = vpop.eup %906 }
 0x2c7   :  { %417 = vrot.lane.b32.xlu2 %v907_v22, %s1034_s0 }
 0x321   :  { %v418_v23 = vpop.permute.xlu2 %417 }
 0x322   :  { %v420_v24 = vsub.f32 %v265_v3, %v418_v23 }
 0x324   :  { %422 = vrot.lane.b32.xlu2 %v420_v24, %s1035_s2 }
 0x37e   :  { %v423_v25 = vpop.permute.xlu2 %422 }
 0x37f   :  { %v425_v27 = vmul.f32 %v423_v25, %v404_v17 }
 0x381   :  { %427 = vrot.lane.b32.xlu1 %v425_v27, %s1035_s2 }
 0x389   :  { %290 = vperm.xlu1 %894, %v288_v29   ;;  %v314_v29 = vsel %vm312_vm11, %v313_v28, %v869_v26 }
 0x3f3   :  { %v428_v31 = vpop.permute.xlu1 %427 }
 0x3f4   :  { %v430_v32 = vadd.f32 %v907_v22, %v428_v31 }
 0x3f6   :  { %v431_v33 = vpack.c.bf16 %v430_v32, %v430_v32 }
 0x3f8   :  { %433 = vrot.lane.b32.xlu2 %v431_v33, %s1034_s0 }
 0x3fb   :  { %v291_v34 = vpop.permute.xlu1 %290 }
 0x3fc   :  { %vm292_vm8 = vcmp.eq.s32.totalorder %v1206_v58, %v291_v34 }
 0x3fd   :  { %v293_v35 = vsel %vm292_vm8, 1.0, %v1033_v60 }
 0x3fe   :  { %v294_v36 = vmul.f32 %v293_v35, %v1213_v62 }
 0x400   :  { %v295_v37 = vsel %vm281_vm5, %v294_v36, 0.0 }
 0x421   :  { %296 = vadd.xlane.f32.xlu2 %v295_v37 }
 0x452   :  { %v434_v38 = vpop.permute.xlu2 %433 }
 0x453   :  { %875 = vmatmul.msk.bf16.vlgmr.msrb.gmra.mxu0 %vm379_vm6, %v434_v38 }
 0x494   :  { %v297_v41 = vpop.xlane.xlu2 %296 }
 0x495   :  { %v451_v42 = vmul.f32 %v1219_v8, %v297_v41 }
 0x497   :  { %v452_v43 = vadd.f32 %v1221_v10, %v451_v42 }
 0x4d0   :  { %v447_v39 = vpop.f32.mrf.mxu0 }
 0x4d1   :  { %459 = vrot.lane.b32.xlu1 %v447_v39, %s1034_s0  ;;  %v453_v44 = vadd.f32 %v452_v43, %v447_v39 }
 0x4d3   :  { %v454_v45 = vmul.f32 0.5, %v453_v44 }
 0x4d5   :  { %908 = vtanh.f32 %v454_v45 }
 0x4d8   :  { %v449_v40 = vpop.f32.mrf.mxu0 }
 0x4db   :  { %v909_v46 = vpop.eup %908 }
 0x4dc   :  { %v456_v47 = vmul.f32 0.5, %v909_v46 }
 0x4de   :  { %v457_v48 = vadd.f32 0.5, %v456_v47 }
 0x543   :  { %v460_v49 = vpop.permute.xlu1 %459 }
 0x544   :  { %v462_v50 = vmul.f32 %v460_v49, %v457_v48 }
 0x546   :  { %464 = vrot.lane.b32.xlu1 %v462_v50, %s1034_s0 }
 0x5b8   :  { %v465_v51 = vpop.permute.xlu1 %464 }
 0x5b9   :  { %v467_v52 = vadd.f32 %v465_v51, %v452_v43 }
 0x5bb   :  { %910 = vtanh.f32 %v467_v52 }
 0x5c1   :  { %v911_v53 = vpop.eup %910 }
 0x5c2   :  { %v469_v54 = vsub.f32 %v430_v32, %v911_v53 }
 0x5c4   :  { %471 = vrot.lane.b32.xlu1 %v469_v54, %s1036_s15 }
 0x636   :  { %v472_v55 = vpop.permute.xlu1 %471 }
 0x637   :  { %v474_v56 = vmul.f32 %v472_v55, %v457_v48 }
 0x639   :  { %476 = vrot.lane.b32.xlu0 %v474_v56, %s1035_s2 }
 0x6ab   :  { %v477_v57 = vpop.permute.xlu0 %476 }
 0x6ac   :  { %v479_v59 = vadd.f32 %v911_v53, %v477_v57  ;;  %v870_v57 = vadd.s32 4294967293, %v1189_v30 }
 0x6ae   :  { %v480_v63 = vpack.c.bf16 %v479_v59, %v479_v59  ;;  %vm325_vm13 = vcmp.lt.s32.totalorder %v870_v57, 0 }
 0x6b0   :  { %482 = vrot.lane.b32.xlu1 %v480_v63, %s1034_s0 }
 0x6b8   :  { %303 = vperm.xlu1 %894, %v301_v1  }
 0x722   :  { %v483_v2 = vpop.permute.xlu1 %482 }
 0x723   :  { %876 = vmatmul.msk.bf16.vlgmr.msrb.gmra.mxu1 %vm379_vm6, %v483_v2 }
 0x72a   :  { %v304_v3 = vpop.permute.xlu1 %303 }
 0x72b   :  { %vm305_vm10 = vcmp.eq.s32.totalorder %v1206_v58, %v304_v3 }
 0x72c   :  { %v306_v4 = vsel %vm305_vm10, 1.0, %v1033_v60 }
 0x72d   :  { %v307_v5 = vmul.f32 %v306_v4, %v1213_v62 }
 0x72f   :  { %v308_v6 = vsel %vm281_vm5, %v307_v5, 0.0 }
 0x730   :  { %309 = vadd.xlane.f32.xlu2 %v308_v6 }
 0x7a0   :  { %v496_v7 = vpop.f32.mrf.mxu1 }
 0x7a1   :  { %508 = vrot.lane.b32.xlu0 %v496_v7, %s1034_s0 }
 0x7a3   :  { %v310_v11 = vpop.xlane.xlu2 %309 }
 0x7a4   :  { %v500_v12 = vmul.f32 %v1219_v8, %v310_v11 }
 0x7a6   :  { %v501_v13 = vadd.f32 %v1221_v10, %v500_v12 }
 0x7a8   :  { %v498_v9 = vpop.f32.mrf.mxu1  ;;  %v502_v14 = vadd.f32 %v501_v13, %v496_v7 }
 0x7aa   :  { %v503_v15 = vmul.f32 0.5, %v502_v14 }
 0x7ac   :  { %912 = vtanh.f32 %v503_v15 }
 0x7b2   :  { %v913_v16 = vpop.eup %912 }
 0x7b3   :  { %v505_v17 = vmul.f32 0.5, %v913_v16 }
 0x7b5   :  { %v506_v18 = vadd.f32 0.5, %v505_v17 }
 0x813   :  { %v509_v19 = vpop.permute.xlu0 %508 }
 0x814   :  { %v511_v20 = vmul.f32 %v509_v19, %v506_v18 }
 0x816   :  { %513 = vrot.lane.b32.xlu1 %v511_v20, %s1034_s0 }
 0x888   :  { %v514_v21 = vpop.permute.xlu1 %513 }
 0x889   :  { %v516_v22 = vadd.f32 %v514_v21, %v501_v13 }
 0x88b   :  { %914 = vtanh.f32 %v516_v22 }
 0x891   :  { %v915_v23 = vpop.eup %914 }
 0x892   :  { %v518_v24 = vsub.f32 %v479_v59, %v915_v23  ;;  %v326_v59 = vadd.s32 96, %v870_v57 }
 0x894   :  { %520 = vrot.lane.b32.xlu2 %v518_v24, %s1036_s15  ;;  %v327_v61 = vsel %vm325_vm13, %v326_v59, %v870_v57 }
 0x8ee   :  { %v521_v25 = vpop.permute.xlu2 %520 }
 0x8ef   :  { %v523_v27 = vmul.f32 %v521_v25, %v506_v18 }
 0x8f1   :  { %525 = vrot.lane.b32.xlu0 %v523_v27, %s1035_s2 }
 0x8f9   :  { %316 = vperm.xlu0 %893, %v314_v29   ;;  %v871_v29 = vadd.s32 4294967294, %v1189_v30 }
 0x8fb   :  { %vm338_vm15 = vcmp.lt.s32.totalorder %v871_v29, 0 }
 0x963   :  { %v526_v31 = vpop.permute.xlu0 %525 }
 0x964   :  { %v528_v32 = vadd.f32 %v915_v23, %v526_v31 }
 0x966   :  { %v529_v33 = vpack.c.bf16 %v528_v32, %v528_v32 }
 0x968   :  { %531 = vrot.lane.b32.xlu1 %v529_v33, %s1034_s0 }
 0x96b   :  { %v317_v34 = vpop.permute.xlu0 %316 }
 0x96c   :  { %vm318_vm12 = vcmp.eq.s32.totalorder %v1206_v58, %v317_v34 }
 0x96d   :  { %v319_v35 = vsel %vm318_vm12, 1.0, %v1033_v60 }
 0x96e   :  { %v320_v36 = vmul.f32 %v319_v35, %v1213_v62 }
 0x970   :  { %v321_v37 = vsel %vm281_vm5, %v320_v36, 0.0 }
 0x992   :  { %322 = vadd.xlane.f32.xlu1 %v321_v37 }
 0x9da   :  { %v532_v38 = vpop.permute.xlu1 %531 }
 0x9db   :  { %877 = vmatmul.msk.bf16.vlgmr.msrb.gmra.mxu2 %vm379_vm6, %v532_v38 }
 0xa05   :  { %v323_v41 = vpop.xlane.xlu1 %322 }
 0xa06   :  { %v549_v42 = vmul.f32 %v1219_v8, %v323_v41 }
 0xa08   :  { %v550_v43 = vadd.f32 %v1221_v10, %v549_v42 }
 0xa5e   :  { %v545_v39 = vpop.f32.mrf.mxu2 }
 0xa5f   :  { %557 = vrot.lane.b32.xlu0 %v545_v39, %s1034_s0  ;;  %v551_v44 = vadd.f32 %v550_v43, %v545_v39 }
 0xa61   :  { %v552_v45 = vmul.f32 0.5, %v551_v44 }
 0xa63   :  { %916 = vtanh.f32 %v552_v45 }
 0xa66   :  { %v547_v40 = vpop.f32.mrf.mxu2 }
 0xa69   :  { %v917_v46 = vpop.eup %916 }
 0xa6a   :  { %v554_v47 = vmul.f32 0.5, %v917_v46 }
 0xa6c   :  { %v555_v48 = vadd.f32 0.5, %v554_v47 }
 0xad1   :  { %v558_v49 = vpop.permute.xlu0 %557 }
 0xad2   :  { %v560_v50 = vmul.f32 %v558_v49, %v555_v48 }
 0xad4   :  { %562 = vrot.lane.b32.xlu2 %v560_v50, %s1034_s0 }
 0xb2e   :  { %v563_v51 = vpop.permute.xlu2 %562 }
 0xb2f   :  { %v565_v52 = vadd.f32 %v563_v51, %v550_v43 }
 0xb31   :  { %918 = vtanh.f32 %v565_v52 }
 0xb37   :  { %v919_v53 = vpop.eup %918 }
 0xb38   :  { %v567_v54 = vsub.f32 %v528_v32, %v919_v53  ;;  %v339_v32 = vadd.s32 96, %v871_v29 }
 0xb3a   :  { %569 = vrot.lane.b32.xlu0 %v567_v54, %s1036_s15  ;;  %v340_v33 = vsel %vm338_vm15, %v339_v32, %v871_v29 }
 0xbac   :  { %v570_v55 = vpop.permute.xlu0 %569 }
 0xbad   :  { %v572_v56 = vmul.f32 %v570_v55, %v555_v48 }
 0xbaf   :  { %574 = vrot.lane.b32.xlu2 %v572_v56, %s1035_s2  ;;  %v872_v56 = vadd.s32 4294967295, %v1189_v30 }
 0xbb1   :  { %v352_v59 = vadd.s32 96, %v872_v56  ;;  %vm351_vm1 = vcmp.lt.s32.totalorder %v872_v56, 0 }
 0xbb7   :  { %329 = vperm.xlu2 %895, %v327_v61   ;;  %v353_v61 = vsel %vm351_vm1, %v352_v59, %v872_v56 }
 0xc09   :  { %v575_v63 = vpop.permute.xlu2 %574 }
 0xc0a   :  { %v577_v0 = vadd.f32 %v919_v53, %v575_v63 }
 0xc0c   :  { %v578_v1 = vpack.c.bf16 %v577_v0, %v577_v0 }
 0xc0e   :  { %580 = vrot.lane.b32.xlu0 %v578_v1, %s1034_s0 }
 0xc11   :  { %v330_v2 = vpop.permute.xlu2 %329 }
 0xc12   :  { %vm331_vm14 = vcmp.eq.s32.totalorder %v1206_v58, %v330_v2 }
 0xc13   :  { %v332_v3 = vsel %vm331_vm14, 1.0, %v1033_v60 }
 0xc14   :  { %v333_v4 = vmul.f32 %v332_v3, %v1213_v62 }
 0xc16   :  { %v334_v5 = vsel %vm281_vm5, %v333_v4, 0.0 }
 0xc38   :  { %335 = vadd.xlane.f32.xlu0 %v334_v5 }
 0xc80   :  { %v581_v6 = vpop.permute.xlu0 %580 }
 0xc81   :  { %878 = vmatmul.msk.bf16.vlgmr.msrb.gmra.mxu3 %vm379_vm6, %v581_v6 }
 0xcab   :  { %v336_v11 = vpop.xlane.xlu0 %335 }
 0xcac   :  { %v598_v12 = vmul.f32 %v1219_v8, %v336_v11 }
 0xcae   :  { %v599_v13 = vadd.f32 %v1221_v10, %v598_v12 }
 0xd04   :  { %v594_v7 = vpop.f32.mrf.mxu3 }
 0xd05   :  { %606 = vrot.lane.b32.xlu2 %v594_v7, %s1034_s0  ;;  %v600_v14 = vadd.f32 %v599_v13, %v594_v7 }
 0xd07   :  { %v601_v15 = vmul.f32 0.5, %v600_v14 }
 0xd09   :  { %920 = vtanh.f32 %v601_v15 }
 0xd0c   :  { %v596_v9 = vpop.f32.mrf.mxu3 }
 0xd0f   :  { %v921_v16 = vpop.eup %920 }
 0xd10   :  { %v603_v17 = vmul.f32 0.5, %v921_v16 }
 0xd12   :  { %v604_v18 = vadd.f32 0.5, %v603_v17 }
 0xd5f   :  { %v607_v19 = vpop.permute.xlu2 %606 }
 0xd60   :  { %v609_v20 = vmul.f32 %v607_v19, %v604_v18 }
 0xd62   :  { %611 = vrot.lane.b32.xlu2 %v609_v20, %s1034_s0  ;;  %v873_v20 = vadd.s32 4294967288, %v1189_v30 }
 0xd64   :  { %vm364_vm3 = vcmp.lt.s32.totalorder %v873_v20, 0 }
 0xdbc   :  { %v612_v21 = vpop.permute.xlu2 %611 }
 0xdbd   :  { %v614_v22 = vadd.f32 %v612_v21, %v599_v13 }
 0xdbf   :  { %922 = vtanh.f32 %v614_v22  ;;  %v365_v22 = vadd.s32 96, %v873_v20 }
 0xdc5   :  { %v923_v23 = vpop.eup %922 }
 0xdc6   :  { %v616_v24 = vsub.f32 %v577_v0, %v923_v23 }
 0xdc8   :  { %618 = vrot.lane.b32.xlu1 %v616_v24, %s1036_s15 }
 0xe3a   :  { %v619_v25 = vpop.permute.xlu1 %618 }
 0xe3b   :  { %v621_v26 = vmul.f32 %v619_v25, %v604_v18 }
 0xe3d   :  { %623 = vrot.lane.b32.xlu2 %v621_v26, %s1035_s2 }
 0xe97   :  { %v624_v27 = vpop.permute.xlu2 %623 }
 0xe98   :  { %v626_v28 = vadd.f32 %v923_v23, %v624_v27  ;;  %v366_v23 = vsel %vm364_vm3, %v365_v22, %v873_v20 }
 0xe9a   :  { %v627_v31 = vpack.c.bf16 %v626_v28, %v626_v28 }
 0xe9c   :  { %629 = vrot.lane.b32.xlu2 %v627_v31, %s1034_s0 }
 0xea4   :  { %342 = vperm.xlu2 %895, %v340_v33  }
 0xef6   :  { %v630_v34 = vpop.permute.xlu2 %629 }
 0xef7   :  { %879 = vmatmul.msk.bf16.vlgmr.msra.gmra.mxu0 %vm379_vm6, %v630_v34 }
 0xefe   :  { %v343_v35 = vpop.permute.xlu2 %342 }
 0xeff   :  { %vm344_vm0 = vcmp.eq.s32.totalorder %v1206_v58, %v343_v35 }
 0xf00   :  { %v345_v36 = vsel %vm344_vm0, 1.0, %v1033_v60 }
 0xf01   :  { %v346_v37 = vmul.f32 %v345_v36, %v1213_v62 }
 0xf03   :  { %v347_v38 = vsel %vm281_vm5, %v346_v37, 0.0 }
 0xf04   :  { %348 = vadd.xlane.f32.xlu1 %v347_v38 }
 0xf74   :  { %v643_v39 = vpop.f32.mrf.mxu0 }
 0xf75   :  { %655 = vrot.lane.b32.xlu0 %v643_v39, %s1034_s0 }
 0xf77   :  { %v349_v41 = vpop.xlane.xlu1 %348 }
 0xf78   :  { %v647_v42 = vmul.f32 %v1219_v8, %v349_v41 }
 0xf7a   :  { %v648_v43 = vadd.f32 %v1221_v10, %v647_v42 }
 0xf7c   :  { %v645_v40 = vpop.f32.mrf.mxu0  ;;  %v649_v44 = vadd.f32 %v648_v43, %v643_v39 }
 0xf7e   :  { %v650_v45 = vmul.f32 0.5, %v649_v44 }
 0xf80   :  { %924 = vtanh.f32 %v650_v45 }
 0xf86   :  { %v925_v46 = vpop.eup %924 }
 0xf87   :  { %v652_v47 = vmul.f32 0.5, %v925_v46 }
 0xf89   :  { %v653_v48 = vadd.f32 0.5, %v652_v47 }
 0xfe7   :  { %v656_v49 = vpop.permute.xlu0 %655 }
 0xfe8   :  { %v658_v50 = vmul.f32 %v656_v49, %v653_v48 }
 0xfea   :  { %660 = vrot.lane.b32.xlu2 %v658_v50, %s1034_s0 }
0x1044   :  { %v661_v51 = vpop.permute.xlu2 %660 }
0x1045   :  { %v663_v52 = vadd.f32 %v661_v51, %v648_v43 }
0x1047   :  { %926 = vtanh.f32 %v663_v52 }
0x104d   :  { %v927_v53 = vpop.eup %926 }
0x104e   :  { %v665_v54 = vsub.f32 %v626_v28, %v927_v53 }
0x1050   :  { %667 = vrot.lane.b32.xlu2 %v665_v54, %s1036_s15 }
0x10aa   :  { %v668_v55 = vpop.permute.xlu2 %667 }
0x10ab   :  { %v670_v57 = vmul.f32 %v668_v55, %v653_v48 }
0x10ad   :  { %672 = vrot.lane.b32.xlu2 %v670_v57, %s1035_s2 }
0x10b5   :  { %355 = vperm.xlu2 %895, %v353_v61   ;;  %v901_v61 = vld [vmem:[#allocation11 + $0x78] ss:$0 sm:$0xff] }
0x1107   :  { %v673_v63 = vpop.permute.xlu2 %672 }
0x1108   :  { %v675_v0 = vadd.f32 %v927_v53, %v673_v63 }
0x110a   :  { %v676_v1 = vpack.c.bf16 %v675_v0, %v675_v0 }
0x110c   :  { %678 = vrot.lane.b32.xlu0 %v676_v1, %s1034_s0 }
0x110f   :  { %v356_v2 = vpop.permute.xlu2 %355 }
0x1110   :  { %vm357_vm2 = vcmp.eq.s32.totalorder %v1206_v58, %v356_v2 }
0x1111   :  { %v358_v3 = vsel %vm357_vm2, 1.0, %v1033_v60 }
0x1112   :  { %v359_v4 = vmul.f32 %v358_v3, %v1213_v62 }
0x1114   :  { %v360_v5 = vsel %vm281_vm5, %v359_v4, 0.0 }
0x1136   :  { %361 = vadd.xlane.f32.xlu0 %v360_v5 }
0x117e   :  { %v679_v6 = vpop.permute.xlu0 %678 }
0x117f   :  { %880 = vmatmul.msk.bf16.vlgmr.msra.gmra.mxu1 %vm379_vm6, %v679_v6 }
0x11a9   :  { %v362_v11 = vpop.xlane.xlu0 %361 }
0x11aa   :  { %v696_v12 = vmul.f32 %v1219_v8, %v362_v11 }
0x11ac   :  { %v697_v13 = vadd.f32 %v1221_v10, %v696_v12 }
0x11fc   :  { %v692_v7 = vpop.f32.mrf.mxu1 }
0x11fd   :  { %704 = vrot.lane.b32.xlu2 %v692_v7, %s1034_s0  ;;  %v698_v14 = vadd.f32 %v697_v13, %v692_v7 }
0x11ff   :  { %v699_v15 = vmul.f32 0.5, %v698_v14 }
0x1201   :  { %928 = vtanh.f32 %v699_v15 }
0x1204   :  { %v694_v9 = vpop.f32.mrf.mxu1 }
0x1207   :  { %v929_v16 = vpop.eup %928 }
0x1208   :  { %v701_v17 = vmul.f32 0.5, %v929_v16 }
0x120a   :  { %v702_v18 = vadd.f32 0.5, %v701_v17 }
0x1257   :  { %v705_v19 = vpop.permute.xlu2 %704 }
0x1258   :  { %v707_v21 = vmul.f32 %v705_v19, %v702_v18 }
0x125a   :  { %709 = vrot.lane.b32.xlu1 %v707_v21, %s1034_s0 }
0x1262   :  { %368 = vperm.xlu1 %894, %v366_v23  }
0x12cc   :  { %v710_v24 = vpop.permute.xlu1 %709 }
0x12cd   :  { %v712_v25 = vadd.f32 %v710_v24, %v697_v13 }
0x12cf   :  { %930 = vtanh.f32 %v712_v25 }
0x12d4   :  { %v369_v33 = vpop.permute.xlu1 %368 }
0x12d5   :  { %v931_v26 = vpop.eup %930  ;;  %vm370_vm4 = vcmp.eq.s32.totalorder %v1206_v58, %v369_v33 }
0x12d6   :  { %v714_v27 = vsub.f32 %v675_v0, %v931_v26  ;;  %v371_v34 = vsel %vm370_vm4, 1.0, %v1033_v60 }
0x12d7   :  { %v372_v35 = vmul.f32 %v371_v34, %v1213_v62 }
0x12d8   :  { %716 = vrot.lane.b32.xlu2 %v714_v27, %s1036_s15 }
0x12d9   :  { %v373_v36 = vsel %vm281_vm5, %v372_v35, 0.0  ;;  %vm790_vm5 = vcmask 7168  }
0x1332   :  { %v717_v28 = vpop.permute.xlu2 %716 }
0x1333   :  { %v719_v29 = vmul.f32 %v717_v28, %v702_v18 }
0x1335   :  { %721 = vrot.lane.b32.xlu2 %v719_v29, %s1035_s2 }
0x138f   :  { %v722_v31 = vpop.permute.xlu2 %721 }
0x1390   :  { %v724_v30 = vadd.f32 %v931_v26, %v722_v31 }
0x1392   :  { %v725_v32 = vpack.c.bf16 %v724_v30, %v724_v30 }
0x1394   :  { %727 = vrot.lane.b32.xlu2 %v725_v32, %s1034_s0 }
0x13bd   :  { %374 = vadd.xlane.f32.xlu2 %v373_v36 }
0x13ee   :  { %v728_v37 = vpop.permute.xlu2 %727 }
0x13ef   :  { %881 = vmatmul.msk.bf16.vlgmr.msra.gmra.mxu2 %vm379_vm6, %v728_v37 }
0x1430   :  { %v375_v40 = vpop.xlane.xlu2 %374 }
0x1431   :  { %v745_v41 = vmul.f32 %v1219_v8, %v375_v40  ;;  %v900_v8 = vld [vmem:[#allocation11 + $0x70] ss:$0 sm:$0xff] }
0x1433   :  { %v746_v42 = vadd.f32 %v1221_v10, %v745_v41 }
0x1472   :  { %v741_v38 = vpop.f32.mrf.mxu2 }
0x1473   :  { %753 = vrot.lane.b32.xlu0 %v741_v38, %s1034_s0  ;;  %v747_v58 = vadd.f32 %v746_v42, %v741_v38 }
0x1475   :  { %v748_v43 = vmul.f32 0.5, %v747_v58 }
0x1477   :  { %932 = vtanh.f32 %v748_v43 }
0x147a   :  { %v743_v39 = vpop.f32.mrf.mxu2 }
0x147b   :  { %777 = vrot.lane.b32.xlu0 %v900_v8, %s1034_s0 }
0x147d   :  { %v933_v60 = vpop.eup %932 }
0x147e   :  { %v750_v62 = vmul.f32 0.5, %v933_v60 }
0x1480   :  { %v751_v44 = vadd.f32 0.5, %v750_v62 }
0x14e5   :  { %v754_v45 = vpop.permute.xlu0 %753 }
0x14e6   :  { %v756_v46 = vmul.f32 %v754_v45, %v751_v44 }
0x14e8   :  { %758 = vrot.lane.b32.xlu1 %v756_v46, %s1034_s0 }
0x14ed   :  { %v778_v54 = vpop.permute.xlu0 %777 }
0x155a   :  { %v759_v47 = vpop.permute.xlu1 %758 }
0x155b   :  { %v761_v48 = vadd.f32 %v759_v47, %v746_v42 }
0x155d   :  { %934 = vtanh.f32 %v761_v48 }
0x1563   :  { %v935_v49 = vpop.eup %934 }
0x1564   :  { %v763_v50 = vsub.f32 %v724_v30, %v935_v49 }
0x1566   :  { %765 = vrot.lane.b32.xlu1 %v763_v50, %s1036_s15 }
0x15d8   :  { %v766_v10 = vpop.permute.xlu1 %765 }
0x15d9   :  { %v768_v51 = vmul.f32 %v766_v10, %v751_v44 }
0x15db   :  { %770 = vrot.lane.b32.xlu1 %v768_v51, %s1035_s2 }
0x164d   :  { %v771_v52 = vpop.permute.xlu1 %770 }
0x164e   :  { %v773_v53 = vadd.f32 %v935_v49, %v771_v52 }
0x1650   :  { %v774_v55 = vmax.f32 %v773_v53, 0.0 }
0x1652   :  { %v780_v56 = vmul.f32 %v778_v54, %v774_v55 }
0x1654   :  { %782 = vrot.lane.b32.xlu1 %v780_v56, %s1034_s0 }
0x16c6   :  { %v783_v57 = vpop.permute.xlu1 %782 }
0x16c7   :  { %v785_v59 = vsel %vm379_vm6, %v783_v57, 0.0 }
0x16c8   :  { %786 = vadd.xlane.f32.xlu0 %v785_v59 }
0x173b   :  { %v787_v63 = vpop.xlane.xlu0 %786 }
0x173c   :  { %v789_v0 = vadd.f32 %v901_v61, %v787_v63 }
0x173e   :  { %791 = vst.msk [vmem:[%s1332_s6] sm:$0xff] %vm790_vm5, %v789_v0 }
0x173f   :  { %796 = vsyncpa [#allocation6], 1 }
0x1740   :  { %797 = vsyncpa [#allocation10], 1 }
0x1741   :  { %798 = vsyncpa [#allocation7], 1 }

</bundles_post_ra>
